<compile_context>
chip_gen: v6e
topology: v6e:2x2x1
jax: 0.10.0
libtpu: 0.0.40
codegen_flags: <defaults>
</compile_context>

<pallas_src>
import functools

import jax
import jax.numpy as jnp
from jax import lax
from jax.experimental import pallas as pl
from jax.experimental.pallas import tpu as pltpu

LEAKY_SLOPE = 0.01  # PyTorch nn.LeakyReLU default
BN_EPS = 1e-5


def _pick_band_rows(H, W, Cin, Cout, budget_bytes=32 << 20, max_rows=256):
    """Largest divisor of H whose (double-buffered) band working set fits budget."""
    best = 1
    for th in range(1, min(H, max_rows) + 1):
        if H % th:
            continue
        in_blk = 2 * th * W * Cin * 2           # double-buffered bf16 input band
        halo = 2 * 2 * W * Cin * 2              # double-buffered halo rows
        out_blk = 2 * th * W * Cout * 4         # double-buffered output band (<= f32)
        work = 4 * (th + 2) * W * Cin * 2       # band + left/right shifted copies
        work += 2 * th * W * Cout * 4           # f32 accumulator + activation temp
        wts = 2 * (9 * Cin * Cout * 2 + Cout * 4)
        if in_blk + halo + out_blk + work + wts <= budget_bytes:
            best = th
    return best


def _conv_bn_lrelu_kernel(top_ref, x_ref, bot_ref, w_ref, bias_ref, o_ref):
    """Fused 3x3 reflect-pad conv + (BN-folded) bias + LeakyReLU on one row band.

    top_ref : (1, 1, W, Cin)   reflected/interior row above the band (bf16)
    x_ref   : (1, TH, W, Cin)  band of input rows (bf16)
    bot_ref : (1, 1, W, Cin)   reflected/interior row below the band (bf16)
    w_ref   : (9, Cin, Cout)   conv taps (BN scale pre-folded), tap = dy*3 + dx (bf16)
    bias_ref: (1, Cout)        folded BN bias (f32)
    o_ref   : (1, TH, W, Cout)
    """
    TH, W, Cin = x_ref.shape[1], x_ref.shape[2], x_ref.shape[3]
    Cout = o_ref.shape[3]

    # (TH+2, W, Cin) band with the 1-row H halo already reflected by the wrapper.
    band = jnp.concatenate([top_ref[0], x_ref[0], bot_ref[0]], axis=0)

    # Reflect padding along W realised as width-W shifted views (output col j
    # reads input col j-1 / j / j+1 with reflection at the borders). Keeping the
    # width at W means every (TH*W, Cin) reshape below is a contiguous merge of
    # leading dims -> no stride-changing relayout copies.
    left = jnp.concatenate([band[:, 1:2, :], band[:, :W - 1, :]], axis=1)       # col j -> j-1
    right = jnp.concatenate([band[:, 1:, :], band[:, W - 2:W - 1, :]], axis=1)  # col j -> j+1
    shifted = (left, band, right)

    acc = jnp.zeros((TH * W, Cout), jnp.float32)
    for dy in range(3):
        for dx in range(3):
            # Leading-axis slice (free) + contiguous reshape; bf16 MXU matmul,
            # f32 accumulate.
            slab = shifted[dx][dy:dy + TH].reshape(TH * W, Cin)
            acc = acc + jnp.dot(slab, w_ref[dy * 3 + dx],
                                preferred_element_type=jnp.float32)

    y = acc + bias_ref[...]                       # BN scale already in the weights
    y = jnp.where(y >= 0, y, LEAKY_SLOPE * y)     # LeakyReLU(0.01); Dropout2d==id (eval)
    o_ref[0] = y.reshape(TH, W, Cout).astype(o_ref.dtype)


def _conv_bn_lrelu(x_nhwc, w_hwio, gamma, beta, run_mean, run_var,
                   *, band_rows=None, out_dtype=jnp.bfloat16):
    """One conv->bn->(dropout=id)->leakyrelu stage. x_nhwc: (N, H, W, Cin)."""
    N, H, W, Cin = x_nhwc.shape
    Cout = w_hwio.shape[-1]
    if H < 2 or W < 2:
        raise ValueError("reflect padding (pad=1) requires H, W >= 2")

    if band_rows is None:
        TH = _pick_band_rows(H, W, Cin, Cout)
    else:
        TH = max(d for d in range(1, min(band_rows, H) + 1) if H % d == 0)
    n_bands = H // TH

    # Fold BatchNorm: scale goes into the conv weights, bias stays a channel add.
    scale = gamma / jnp.sqrt(run_var + BN_EPS)                        # (Cout,)
    bias = (beta - run_mean * scale).astype(jnp.float32).reshape(1, Cout)
    w_taps = (w_hwio * scale[None, None, None, :]).reshape(9, Cin, Cout)
    w_taps = w_taps.astype(jnp.bfloat16)

    x = x_nhwc.astype(jnp.bfloat16)

    # Per-band 1-row halos with top/bottom reflection (tiny gathers, replaces
    # the full padded-copy HBM round trip of jnp.pad).
    r0s = list(range(0, H, TH))
    top_idx = jnp.asarray([1 if r == 0 else r - 1 for r in r0s], dtype=jnp.int32)
    bot_idx = jnp.asarray([H - 2 if r + TH == H else r + TH for r in r0s],
                          dtype=jnp.int32)
    top = x[:, top_idx]     # (N, n_bands, W, Cin)
    bot = x[:, bot_idx]     # (N, n_bands, W, Cin)

    return pl.pallas_call(
        _conv_bn_lrelu_kernel,
        out_shape=jax.ShapeDtypeStruct((N, H, W, Cout), out_dtype),
        grid=(N, n_bands),
        in_specs=[
            pl.BlockSpec((1, 1, W, Cin), lambda n, h: (n, h, 0, 0)),
            pl.BlockSpec((1, TH, W, Cin), lambda n, h: (n, h, 0, 0)),
            pl.BlockSpec((1, 1, W, Cin), lambda n, h: (n, h, 0, 0)),
            pl.BlockSpec((9, Cin, Cout), lambda n, h: (0, 0, 0)),
            pl.BlockSpec((1, Cout), lambda n, h: (0, 0)),
        ],
        out_specs=pl.BlockSpec((1, TH, W, Cout), lambda n, h: (n, h, 0, 0)),
        compiler_params=pltpu.CompilerParams(
            dimension_semantics=("parallel", "parallel"),
            vmem_limit_bytes=48 * 1024 * 1024),
    )(top, x, bot, w_taps, bias)


def conv_block_forward(x_nchw, params, *, band_rows=None):
    """Conv_Block.forward. x_nchw: (N, Cin, H, W) -> (N, Cout, H, W) float32."""
    x = jnp.transpose(x_nchw, (0, 2, 3, 1))                 # NCHW -> NHWC
    x = _conv_bn_lrelu(x, params["w1"], params["g1"], params["b1"],
                       params["m1"], params["v1"],
                       band_rows=band_rows, out_dtype=jnp.bfloat16)
    x = _conv_bn_lrelu(x, params["w2"], params["g2"], params["b2"],
                       params["m2"], params["v2"],
                       band_rows=band_rows, out_dtype=jnp.float32)
    return jnp.transpose(x, (0, 3, 1, 2))                   # NHWC -> NCHW


# ----------------------- pure-JAX reference (for checking) ------------------
def _ref_stage(x_nhwc, w_hwio, gamma, beta, run_mean, run_var):
    xp = jnp.pad(x_nhwc, ((0, 0), (1, 1), (1, 1), (0, 0)), mode="reflect")
    y = lax.conv_general_dilated(
        xp, w_hwio, window_strides=(1, 1), padding="VALID",
        dimension_numbers=("NHWC", "HWIO", "NHWC"))
    scale = gamma / jnp.sqrt(run_var + BN_EPS)
    y = y * scale + (beta - run_mean * scale)
    return jnp.where(y >= 0, y, LEAKY_SLOPE * y)


def conv_block_reference(x_nchw, params):
    x = jnp.transpose(x_nchw, (0, 2, 3, 1))
    x = _ref_stage(x, params["w1"], params["g1"], params["b1"],
                   params["m1"], params["v1"])
    x = _ref_stage(x, params["w2"], params["g2"], params["b2"],
                   params["m2"], params["v2"])
    return jnp.transpose(x, (0, 3, 1, 2))


# ----------------------------- parameter init -------------------------------
def init_params(key, in_channel, out_channel):
    k = jax.random.split(key, 8)
    # Conv weights in HWIO layout (PyTorch (Cout,Cin,3,3) transposed to (3,3,Cin,Cout)).
    w1 = 0.1 * jax.random.normal(k[0], (3, 3, in_channel, out_channel), jnp.float32)
    w2 = 0.1 * jax.random.normal(k[1], (3, 3, out_channel, out_channel), jnp.float32)
    return {
        "w1": w1,
        "g1": 1.0 + 0.1 * jax.random.normal(k[2], (out_channel,), jnp.float32),
        "b1": 0.1 * jax.random.normal(k[3], (out_channel,), jnp.float32),
        "m1": 0.05 * jax.random.normal(k[4], (out_channel,), jnp.float32),
        "v1": 1.0 + 0.1 * jax.random.uniform(k[5], (out_channel,), jnp.float32),
        "w2": w2,
        "g2": 1.0 + 0.1 * jax.random.normal(k[6], (out_channel,), jnp.float32),
        "b2": 0.1 * jax.random.normal(k[7], (out_channel,), jnp.float32),
        "m2": jnp.linspace(-0.05, 0.05, out_channel, dtype=jnp.float32),
        "v2": jnp.linspace(0.9, 1.1, out_channel, dtype=jnp.float32),
    }


if __name__ == "__main__":
    key = jax.random.PRNGKey(0)
    kx, kp = jax.random.split(key)

    N, Cin, Cout, H, W = 2, 4, 8, 16, 16
    x = jax.random.normal(kx, (N, Cin, H, W), jnp.float32)
    params = init_params(kp, Cin, Cout)

    # band_rows=8 -> 2 row bands per image: exercises both the reflected edge
    # bands and the interior-halo path.
    fwd = jax.jit(functools.partial(conv_block_forward, band_rows=8))
    out = jax.block_until_ready(fwd(x, params))

    ref = jax.block_until_ready(conv_block_reference(x, params))
    assert out.shape == (N, Cout, H, W)
    assert out.dtype == jnp.float32
    max_err = float(jnp.max(jnp.abs(out - ref)))
    # bf16 operands (f32 accumulate) -> looser tolerance than a pure-f32 kernel.
    assert jnp.allclose(out, ref, atol=2e-2, rtol=2e-2), f"max abs err {max_err}"

    print("KERNEL_OK")
</pallas_src>

<mosaic_0001>
module attributes {stable_mosaic.version = 11 : i64} {
  func.func @_conv_bn_lrelu_kernel(%arg0: i32, %arg1: i32, %arg2: memref<1x1x16x4xbf16, #tpu.memory_space<vmem>>, %arg3: memref<1x8x16x4xbf16, #tpu.memory_space<vmem>>, %arg4: memref<1x1x16x4xbf16, #tpu.memory_space<vmem>>, %arg5: memref<9x4x8xbf16, #tpu.memory_space<vmem>>, %arg6: memref<1x8xf32, #tpu.memory_space<vmem>>, %arg7: memref<1x8x16x8xbf16, #tpu.memory_space<vmem>>) attributes {dimension_semantics = [#tpu.dimension_semantics<parallel>, #tpu.dimension_semantics<parallel>], iteration_bounds = array<i64: 2, 2>, scalar_prefetch = 0 : i64, scratch_operands = 0 : i64, tpu.core_type = #tpu.core_type<tc>, window_params = [{transform_indices = @transform_0, window_bounds = array<i64: 1, 1, 16, 4>}, {transform_indices = @transform_1, window_bounds = array<i64: 1, 8, 16, 4>}, {transform_indices = @transform_2, window_bounds = array<i64: 1, 1, 16, 4>}, {pipeline_mode = #tpu.pipeline_mode<synchronous>, transform_indices = @transform_3, window_bounds = array<i64: 9, 4, 8>}, {pipeline_mode = #tpu.pipeline_mode<synchronous>, transform_indices = @transform_4, window_bounds = array<i64: 1, 8>}, {transform_indices = @transform_5, window_bounds = array<i64: 1, 8, 16, 8>}]} {
    %c0 = arith.constant 0 : index
    %c0_0 = arith.constant 0 : index
    %c0_1 = arith.constant 0 : index
    %c0_2 = arith.constant 0 : index
    %0 = vector.load %arg2[%c0, %c0_0, %c0_1, %c0_2] : memref<1x1x16x4xbf16, #tpu.memory_space<vmem>>, vector<1x1x16x4xbf16>
    %1 = vector.shape_cast %0 : vector<1x1x16x4xbf16> to vector<1x16x4xbf16>
    %c0_3 = arith.constant 0 : index
    %c0_4 = arith.constant 0 : index
    %c0_5 = arith.constant 0 : index
    %c0_6 = arith.constant 0 : index
    %2 = vector.load %arg3[%c0_3, %c0_4, %c0_5, %c0_6] : memref<1x8x16x4xbf16, #tpu.memory_space<vmem>>, vector<1x8x16x4xbf16>
    %3 = vector.shape_cast %2 : vector<1x8x16x4xbf16> to vector<8x16x4xbf16>
    %c0_7 = arith.constant 0 : index
    %c0_8 = arith.constant 0 : index
    %c0_9 = arith.constant 0 : index
    %c0_10 = arith.constant 0 : index
    %4 = vector.load %arg4[%c0_7, %c0_8, %c0_9, %c0_10] : memref<1x1x16x4xbf16, #tpu.memory_space<vmem>>, vector<1x1x16x4xbf16>
    %5 = vector.shape_cast %4 : vector<1x1x16x4xbf16> to vector<1x16x4xbf16>
    %6 = tpu.concatenate %1, %3, %5 in 0 : vector<1x16x4xbf16>, vector<8x16x4xbf16>, vector<1x16x4xbf16> -> vector<10x16x4xbf16>
    %7 = vector.extract_strided_slice %6 {offsets = [0, 1, 0], sizes = [10, 1, 4], strides = [1, 1, 1]} : vector<10x16x4xbf16> to vector<10x1x4xbf16>
    %8 = vector.extract_strided_slice %6 {offsets = [0, 0, 0], sizes = [10, 15, 4], strides = [1, 1, 1]} : vector<10x16x4xbf16> to vector<10x15x4xbf16>
    %9 = tpu.concatenate %7, %8 in 1 : vector<10x1x4xbf16>, vector<10x15x4xbf16> -> vector<10x16x4xbf16>
    %10 = vector.extract_strided_slice %6 {offsets = [0, 1, 0], sizes = [10, 15, 4], strides = [1, 1, 1]} : vector<10x16x4xbf16> to vector<10x15x4xbf16>
    %11 = vector.extract_strided_slice %6 {offsets = [0, 14, 0], sizes = [10, 1, 4], strides = [1, 1, 1]} : vector<10x16x4xbf16> to vector<10x1x4xbf16>
    %12 = tpu.concatenate %10, %11 in 1 : vector<10x15x4xbf16>, vector<10x1x4xbf16> -> vector<10x16x4xbf16>
    %cst = arith.constant 0.000000e+00 : f32
    %13 = vector.broadcast %cst : f32 to vector<128x8xf32>
    %14 = vector.extract_strided_slice %9 {offsets = [0, 0, 0], sizes = [8, 16, 4], strides = [1, 1, 1]} : vector<10x16x4xbf16> to vector<8x16x4xbf16>
    %15 = vector.shape_cast %14 : vector<8x16x4xbf16> to vector<128x4xbf16>
    %c0_11 = arith.constant 0 : index
    %c0_12 = arith.constant 0 : index
    %c0_13 = arith.constant 0 : index
    %16 = vector.load %arg5[%c0_11, %c0_12, %c0_13] : memref<9x4x8xbf16, #tpu.memory_space<vmem>>, vector<1x4x8xbf16>
    %17 = vector.shape_cast %16 : vector<1x4x8xbf16> to vector<4x8xbf16>
    %cst_14 = arith.constant dense<0.000000e+00> : vector<128x8xf32>
    %18 = tpu.matmul %15, %17, %cst_14 {dimension_numbers = #tpu.dot_dimension_numbers<[1], [0], [0], [1], [0, 0, 1, 1], [], []>} : vector<128x4xbf16>, vector<4x8xbf16>, vector<128x8xf32> -> vector<128x8xf32>
    %19 = arith.addf %13, %18 : vector<128x8xf32>
    %20 = vector.extract_strided_slice %6 {offsets = [0, 0, 0], sizes = [8, 16, 4], strides = [1, 1, 1]} : vector<10x16x4xbf16> to vector<8x16x4xbf16>
    %21 = vector.shape_cast %20 : vector<8x16x4xbf16> to vector<128x4xbf16>
    %c1 = arith.constant 1 : index
    %c0_15 = arith.constant 0 : index
    %c0_16 = arith.constant 0 : index
    %22 = vector.load %arg5[%c1, %c0_15, %c0_16] : memref<9x4x8xbf16, #tpu.memory_space<vmem>>, vector<1x4x8xbf16>
    %23 = vector.shape_cast %22 : vector<1x4x8xbf16> to vector<4x8xbf16>
    %cst_17 = arith.constant dense<0.000000e+00> : vector<128x8xf32>
    %24 = tpu.matmul %21, %23, %cst_17 {dimension_numbers = #tpu.dot_dimension_numbers<[1], [0], [0], [1], [0, 0, 1, 1], [], []>} : vector<128x4xbf16>, vector<4x8xbf16>, vector<128x8xf32> -> vector<128x8xf32>
    %25 = arith.addf %19, %24 : vector<128x8xf32>
    %26 = vector.extract_strided_slice %12 {offsets = [0, 0, 0], sizes = [8, 16, 4], strides = [1, 1, 1]} : vector<10x16x4xbf16> to vector<8x16x4xbf16>
    %27 = vector.shape_cast %26 : vector<8x16x4xbf16> to vector<128x4xbf16>
    %c2 = arith.constant 2 : index
    %c0_18 = arith.constant 0 : index
    %c0_19 = arith.constant 0 : index
    %28 = vector.load %arg5[%c2, %c0_18, %c0_19] : memref<9x4x8xbf16, #tpu.memory_space<vmem>>, vector<1x4x8xbf16>
    %29 = vector.shape_cast %28 : vector<1x4x8xbf16> to vector<4x8xbf16>
    %cst_20 = arith.constant dense<0.000000e+00> : vector<128x8xf32>
    %30 = tpu.matmul %27, %29, %cst_20 {dimension_numbers = #tpu.dot_dimension_numbers<[1], [0], [0], [1], [0, 0, 1, 1], [], []>} : vector<128x4xbf16>, vector<4x8xbf16>, vector<128x8xf32> -> vector<128x8xf32>
    %31 = arith.addf %25, %30 : vector<128x8xf32>
    %32 = vector.extract_strided_slice %9 {offsets = [1, 0, 0], sizes = [8, 16, 4], strides = [1, 1, 1]} : vector<10x16x4xbf16> to vector<8x16x4xbf16>
    %33 = vector.shape_cast %32 : vector<8x16x4xbf16> to vector<128x4xbf16>
    %c3 = arith.constant 3 : index
    %c0_21 = arith.constant 0 : index
    %c0_22 = arith.constant 0 : index
    %34 = vector.load %arg5[%c3, %c0_21, %c0_22] : memref<9x4x8xbf16, #tpu.memory_space<vmem>>, vector<1x4x8xbf16>
    %35 = vector.shape_cast %34 : vector<1x4x8xbf16> to vector<4x8xbf16>
    %cst_23 = arith.constant dense<0.000000e+00> : vector<128x8xf32>
    %36 = tpu.matmul %33, %35, %cst_23 {dimension_numbers = #tpu.dot_dimension_numbers<[1], [0], [0], [1], [0, 0, 1, 1], [], []>} : vector<128x4xbf16>, vector<4x8xbf16>, vector<128x8xf32> -> vector<128x8xf32>
    %37 = arith.addf %31, %36 : vector<128x8xf32>
    %38 = vector.extract_strided_slice %6 {offsets = [1, 0, 0], sizes = [8, 16, 4], strides = [1, 1, 1]} : vector<10x16x4xbf16> to vector<8x16x4xbf16>
    %39 = vector.shape_cast %38 : vector<8x16x4xbf16> to vector<128x4xbf16>
    %c4 = arith.constant 4 : index
    %c0_24 = arith.constant 0 : index
    %c0_25 = arith.constant 0 : index
    %40 = vector.load %arg5[%c4, %c0_24, %c0_25] : memref<9x4x8xbf16, #tpu.memory_space<vmem>>, vector<1x4x8xbf16>
    %41 = vector.shape_cast %40 : vector<1x4x8xbf16> to vector<4x8xbf16>
    %cst_26 = arith.constant dense<0.000000e+00> : vector<128x8xf32>
    %42 = tpu.matmul %39, %41, %cst_26 {dimension_numbers = #tpu.dot_dimension_numbers<[1], [0], [0], [1], [0, 0, 1, 1], [], []>} : vector<128x4xbf16>, vector<4x8xbf16>, vector<128x8xf32> -> vector<128x8xf32>
    %43 = arith.addf %37, %42 : vector<128x8xf32>
    %44 = vector.extract_strided_slice %12 {offsets = [1, 0, 0], sizes = [8, 16, 4], strides = [1, 1, 1]} : vector<10x16x4xbf16> to vector<8x16x4xbf16>
    %45 = vector.shape_cast %44 : vector<8x16x4xbf16> to vector<128x4xbf16>
    %c5 = arith.constant 5 : index
    %c0_27 = arith.constant 0 : index
    %c0_28 = arith.constant 0 : index
    %46 = vector.load %arg5[%c5, %c0_27, %c0_28] : memref<9x4x8xbf16, #tpu.memory_space<vmem>>, vector<1x4x8xbf16>
    %47 = vector.shape_cast %46 : vector<1x4x8xbf16> to vector<4x8xbf16>
    %cst_29 = arith.constant dense<0.000000e+00> : vector<128x8xf32>
    %48 = tpu.matmul %45, %47, %cst_29 {dimension_numbers = #tpu.dot_dimension_numbers<[1], [0], [0], [1], [0, 0, 1, 1], [], []>} : vector<128x4xbf16>, vector<4x8xbf16>, vector<128x8xf32> -> vector<128x8xf32>
    %49 = arith.addf %43, %48 : vector<128x8xf32>
    %50 = vector.extract_strided_slice %9 {offsets = [2, 0, 0], sizes = [8, 16, 4], strides = [1, 1, 1]} : vector<10x16x4xbf16> to vector<8x16x4xbf16>
    %51 = vector.shape_cast %50 : vector<8x16x4xbf16> to vector<128x4xbf16>
    %c6 = arith.constant 6 : index
    %c0_30 = arith.constant 0 : index
    %c0_31 = arith.constant 0 : index
    %52 = vector.load %arg5[%c6, %c0_30, %c0_31] : memref<9x4x8xbf16, #tpu.memory_space<vmem>>, vector<1x4x8xbf16>
    %53 = vector.shape_cast %52 : vector<1x4x8xbf16> to vector<4x8xbf16>
    %cst_32 = arith.constant dense<0.000000e+00> : vector<128x8xf32>
    %54 = tpu.matmul %51, %53, %cst_32 {dimension_numbers = #tpu.dot_dimension_numbers<[1], [0], [0], [1], [0, 0, 1, 1], [], []>} : vector<128x4xbf16>, vector<4x8xbf16>, vector<128x8xf32> -> vector<128x8xf32>
    %55 = arith.addf %49, %54 : vector<128x8xf32>
    %56 = vector.extract_strided_slice %6 {offsets = [2, 0, 0], sizes = [8, 16, 4], strides = [1, 1, 1]} : vector<10x16x4xbf16> to vector<8x16x4xbf16>
    %57 = vector.shape_cast %56 : vector<8x16x4xbf16> to vector<128x4xbf16>
    %c7 = arith.constant 7 : index
    %c0_33 = arith.constant 0 : index
    %c0_34 = arith.constant 0 : index
    %58 = vector.load %arg5[%c7, %c0_33, %c0_34] : memref<9x4x8xbf16, #tpu.memory_space<vmem>>, vector<1x4x8xbf16>
    %59 = vector.shape_cast %58 : vector<1x4x8xbf16> to vector<4x8xbf16>
    %cst_35 = arith.constant dense<0.000000e+00> : vector<128x8xf32>
    %60 = tpu.matmul %57, %59, %cst_35 {dimension_numbers = #tpu.dot_dimension_numbers<[1], [0], [0], [1], [0, 0, 1, 1], [], []>} : vector<128x4xbf16>, vector<4x8xbf16>, vector<128x8xf32> -> vector<128x8xf32>
    %61 = arith.addf %55, %60 : vector<128x8xf32>
    %62 = vector.extract_strided_slice %12 {offsets = [2, 0, 0], sizes = [8, 16, 4], strides = [1, 1, 1]} : vector<10x16x4xbf16> to vector<8x16x4xbf16>
    %63 = vector.shape_cast %62 : vector<8x16x4xbf16> to vector<128x4xbf16>
    %c8 = arith.constant 8 : index
    %c0_36 = arith.constant 0 : index
    %c0_37 = arith.constant 0 : index
    %64 = vector.load %arg5[%c8, %c0_36, %c0_37] : memref<9x4x8xbf16, #tpu.memory_space<vmem>>, vector<1x4x8xbf16>
    %65 = vector.shape_cast %64 : vector<1x4x8xbf16> to vector<4x8xbf16>
    %cst_38 = arith.constant dense<0.000000e+00> : vector<128x8xf32>
    %66 = tpu.matmul %63, %65, %cst_38 {dimension_numbers = #tpu.dot_dimension_numbers<[1], [0], [0], [1], [0, 0, 1, 1], [], []>} : vector<128x4xbf16>, vector<4x8xbf16>, vector<128x8xf32> -> vector<128x8xf32>
    %67 = arith.addf %61, %66 : vector<128x8xf32>
    %c0_39 = arith.constant 0 : index
    %c0_40 = arith.constant 0 : index
    %68 = vector.load %arg6[%c0_39, %c0_40] : memref<1x8xf32, #tpu.memory_space<vmem>>, vector<1x8xf32>
    %69 = vector.broadcast %68 : vector<1x8xf32> to vector<128x8xf32>
    %70 = arith.addf %67, %69 : vector<128x8xf32>
    %cst_41 = arith.constant 0.000000e+00 : f32
    %71 = vector.broadcast %cst_41 : f32 to vector<128x8xf32>
    %72 = arith.cmpf oge, %70, %71 : vector<128x8xf32>
    %cst_42 = arith.constant 0.00999999977 : f32
    %73 = vector.broadcast %cst_42 : f32 to vector<128x8xf32>
    %74 = arith.mulf %73, %70 : vector<128x8xf32>
    %75 = arith.select %72, %70, %74 : vector<128x8xi1>, vector<128x8xf32>
    %76 = vector.shape_cast %75 : vector<128x8xf32> to vector<8x16x8xf32>
    %77 = arith.truncf %76 : vector<8x16x8xf32> to vector<8x16x8xbf16>
    %c0_43 = arith.constant 0 : index
    %c0_44 = arith.constant 0 : index
    %c0_45 = arith.constant 0 : index
    %c0_46 = arith.constant 0 : index
    %78 = vector.load %arg7[%c0_43, %c0_44, %c0_45, %c0_46] : memref<1x8x16x8xbf16, #tpu.memory_space<vmem>>, vector<1x8x16x8xbf16>
    %79 = vector.shape_cast %78 : vector<1x8x16x8xbf16> to vector<8x16x8xbf16>
    %80 = vector.shape_cast %77 : vector<8x16x8xbf16> to vector<1x8x16x8xbf16>
    tpu.vector_store %arg7[%c0_43, %c0_44, %c0_45, %c0_46], %80 {strides = array<i32>} : memref<1x8x16x8xbf16, #tpu.memory_space<vmem>>, vector<1x8x16x8xbf16>,
    return
  }
  func.func @transform_0(%arg0: i32, %arg1: i32) -> (i32, i32, i32, i32) {
    %c0_i32 = arith.constant 0 : i32
    %c0_i32_0 = arith.constant 0 : i32
    %c0_i32_1 = arith.constant 0 : i32
    return %arg0, %arg1, %c0_i32, %c0_i32_0 : i32, i32, i32, i32
  }
  func.func @transform_1(%arg0: i32, %arg1: i32) -> (i32, i32, i32, i32) {
    %c0_i32 = arith.constant 0 : i32
    %c0_i32_0 = arith.constant 0 : i32
    %c0_i32_1 = arith.constant 0 : i32
    return %arg0, %arg1, %c0_i32, %c0_i32_0 : i32, i32, i32, i32
  }
  func.func @transform_2(%arg0: i32, %arg1: i32) -> (i32, i32, i32, i32) {
    %c0_i32 = arith.constant 0 : i32
    %c0_i32_0 = arith.constant 0 : i32
    %c0_i32_1 = arith.constant 0 : i32
    return %arg0, %arg1, %c0_i32, %c0_i32_0 : i32, i32, i32, i32
  }
  func.func @transform_3(%arg0: i32, %arg1: i32) -> (i32, i32, i32) {
    %c0_i32 = arith.constant 0 : i32
    %c0_i32_0 = arith.constant 0 : i32
    %c0_i32_1 = arith.constant 0 : i32
    %c0_i32_2 = arith.constant 0 : i32
    return %c0_i32, %c0_i32_0, %c0_i32_1 : i32, i32, i32
  }
  func.func @transform_4(%arg0: i32, %arg1: i32) -> (i32, i32) {
    %c0_i32 = arith.constant 0 : i32
    %c0_i32_0 = arith.constant 0 : i32
    %c0_i32_1 = arith.constant 0 : i32
    return %c0_i32, %c0_i32_0 : i32, i32
  }
  func.func @transform_5(%arg0: i32, %arg1: i32) -> (i32, i32, i32, i32) {
    %c0_i32 = arith.constant 0 : i32
    %c0_i32_0 = arith.constant 0 : i32
    %c0_i32_1 = arith.constant 0 : i32
    return %arg0, %arg1, %c0_i32, %c0_i32_0 : i32, i32, i32, i32
  }
}

module attributes {stable_mosaic.version = 11 : i64} {
  func.func @_conv_bn_lrelu_kernel(%arg0: i32, %arg1: i32, %arg2: memref<1x1x16x8xbf16, #tpu.memory_space<vmem>>, %arg3: memref<1x8x16x8xbf16, #tpu.memory_space<vmem>>, %arg4: memref<1x1x16x8xbf16, #tpu.memory_space<vmem>>, %arg5: memref<9x8x8xbf16, #tpu.memory_space<vmem>>, %arg6: memref<1x8xf32, #tpu.memory_space<vmem>>, %arg7: memref<1x8x16x8xf32, #tpu.memory_space<vmem>>) attributes {dimension_semantics = [#tpu.dimension_semantics<parallel>, #tpu.dimension_semantics<parallel>], iteration_bounds = array<i64: 2, 2>, scalar_prefetch = 0 : i64, scratch_operands = 0 : i64, tpu.core_type = #tpu.core_type<tc>, window_params = [{transform_indices = @transform_0, window_bounds = array<i64: 1, 1, 16, 8>}, {transform_indices = @transform_1, window_bounds = array<i64: 1, 8, 16, 8>}, {transform_indices = @transform_2, window_bounds = array<i64: 1, 1, 16, 8>}, {pipeline_mode = #tpu.pipeline_mode<synchronous>, transform_indices = @transform_3, window_bounds = array<i64: 9, 8, 8>}, {pipeline_mode = #tpu.pipeline_mode<synchronous>, transform_indices = @transform_4, window_bounds = array<i64: 1, 8>}, {transform_indices = @transform_5, window_bounds = array<i64: 1, 8, 16, 8>}]} {
    %c0 = arith.constant 0 : index
    %c0_0 = arith.constant 0 : index
    %c0_1 = arith.constant 0 : index
    %c0_2 = arith.constant 0 : index
    %0 = vector.load %arg2[%c0, %c0_0, %c0_1, %c0_2] : memref<1x1x16x8xbf16, #tpu.memory_space<vmem>>, vector<1x1x16x8xbf16>
    %1 = vector.shape_cast %0 : vector<1x1x16x8xbf16> to vector<1x16x8xbf16>
    %c0_3 = arith.constant 0 : index
    %c0_4 = arith.constant 0 : index
    %c0_5 = arith.constant 0 : index
    %c0_6 = arith.constant 0 : index
    %2 = vector.load %arg3[%c0_3, %c0_4, %c0_5, %c0_6] : memref<1x8x16x8xbf16, #tpu.memory_space<vmem>>, vector<1x8x16x8xbf16>
    %3 = vector.shape_cast %2 : vector<1x8x16x8xbf16> to vector<8x16x8xbf16>
    %c0_7 = arith.constant 0 : index
    %c0_8 = arith.constant 0 : index
    %c0_9 = arith.constant 0 : index
    %c0_10 = arith.constant 0 : index
    %4 = vector.load %arg4[%c0_7, %c0_8, %c0_9, %c0_10] : memref<1x1x16x8xbf16, #tpu.memory_space<vmem>>, vector<1x1x16x8xbf16>
    %5 = vector.shape_cast %4 : vector<1x1x16x8xbf16> to vector<1x16x8xbf16>
    %6 = tpu.concatenate %1, %3, %5 in 0 : vector<1x16x8xbf16>, vector<8x16x8xbf16>, vector<1x16x8xbf16> -> vector<10x16x8xbf16>
    %7 = vector.extract_strided_slice %6 {offsets = [0, 1, 0], sizes = [10, 1, 8], strides = [1, 1, 1]} : vector<10x16x8xbf16> to vector<10x1x8xbf16>
    %8 = vector.extract_strided_slice %6 {offsets = [0, 0, 0], sizes = [10, 15, 8], strides = [1, 1, 1]} : vector<10x16x8xbf16> to vector<10x15x8xbf16>
    %9 = tpu.concatenate %7, %8 in 1 : vector<10x1x8xbf16>, vector<10x15x8xbf16> -> vector<10x16x8xbf16>
    %10 = vector.extract_strided_slice %6 {offsets = [0, 1, 0], sizes = [10, 15, 8], strides = [1, 1, 1]} : vector<10x16x8xbf16> to vector<10x15x8xbf16>
    %11 = vector.extract_strided_slice %6 {offsets = [0, 14, 0], sizes = [10, 1, 8], strides = [1, 1, 1]} : vector<10x16x8xbf16> to vector<10x1x8xbf16>
    %12 = tpu.concatenate %10, %11 in 1 : vector<10x15x8xbf16>, vector<10x1x8xbf16> -> vector<10x16x8xbf16>
    %cst = arith.constant 0.000000e+00 : f32
    %13 = vector.broadcast %cst : f32 to vector<128x8xf32>
    %14 = vector.extract_strided_slice %9 {offsets = [0, 0, 0], sizes = [8, 16, 8], strides = [1, 1, 1]} : vector<10x16x8xbf16> to vector<8x16x8xbf16>
    %15 = vector.shape_cast %14 : vector<8x16x8xbf16> to vector<128x8xbf16>
    %c0_11 = arith.constant 0 : index
    %c0_12 = arith.constant 0 : index
    %c0_13 = arith.constant 0 : index
    %16 = vector.load %arg5[%c0_11, %c0_12, %c0_13] : memref<9x8x8xbf16, #tpu.memory_space<vmem>>, vector<1x8x8xbf16>
    %17 = vector.shape_cast %16 : vector<1x8x8xbf16> to vector<8x8xbf16>
    %cst_14 = arith.constant dense<0.000000e+00> : vector<128x8xf32>
    %18 = tpu.matmul %15, %17, %cst_14 {dimension_numbers = #tpu.dot_dimension_numbers<[1], [0], [0], [1], [0, 0, 1, 1], [], []>} : vector<128x8xbf16>, vector<8x8xbf16>, vector<128x8xf32> -> vector<128x8xf32>
    %19 = arith.addf %13, %18 : vector<128x8xf32>
    %20 = vector.extract_strided_slice %6 {offsets = [0, 0, 0], sizes = [8, 16, 8], strides = [1, 1, 1]} : vector<10x16x8xbf16> to vector<8x16x8xbf16>
    %21 = vector.shape_cast %20 : vector<8x16x8xbf16> to vector<128x8xbf16>
    %c1 = arith.constant 1 : index
    %c0_15 = arith.constant 0 : index
    %c0_16 = arith.constant 0 : index
    %22 = vector.load %arg5[%c1, %c0_15, %c0_16] : memref<9x8x8xbf16, #tpu.memory_space<vmem>>, vector<1x8x8xbf16>
    %23 = vector.shape_cast %22 : vector<1x8x8xbf16> to vector<8x8xbf16>
    %cst_17 = arith.constant dense<0.000000e+00> : vector<128x8xf32>
    %24 = tpu.matmul %21, %23, %cst_17 {dimension_numbers = #tpu.dot_dimension_numbers<[1], [0], [0], [1], [0, 0, 1, 1], [], []>} : vector<128x8xbf16>, vector<8x8xbf16>, vector<128x8xf32> -> vector<128x8xf32>
    %25 = arith.addf %19, %24 : vector<128x8xf32>
    %26 = vector.extract_strided_slice %12 {offsets = [0, 0, 0], sizes = [8, 16, 8], strides = [1, 1, 1]} : vector<10x16x8xbf16> to vector<8x16x8xbf16>
    %27 = vector.shape_cast %26 : vector<8x16x8xbf16> to vector<128x8xbf16>
    %c2 = arith.constant 2 : index
    %c0_18 = arith.constant 0 : index
    %c0_19 = arith.constant 0 : index
    %28 = vector.load %arg5[%c2, %c0_18, %c0_19] : memref<9x8x8xbf16, #tpu.memory_space<vmem>>, vector<1x8x8xbf16>
    %29 = vector.shape_cast %28 : vector<1x8x8xbf16> to vector<8x8xbf16>
    %cst_20 = arith.constant dense<0.000000e+00> : vector<128x8xf32>
    %30 = tpu.matmul %27, %29, %cst_20 {dimension_numbers = #tpu.dot_dimension_numbers<[1], [0], [0], [1], [0, 0, 1, 1], [], []>} : vector<128x8xbf16>, vector<8x8xbf16>, vector<128x8xf32> -> vector<128x8xf32>
    %31 = arith.addf %25, %30 : vector<128x8xf32>
    %32 = vector.extract_strided_slice %9 {offsets = [1, 0, 0], sizes = [8, 16, 8], strides = [1, 1, 1]} : vector<10x16x8xbf16> to vector<8x16x8xbf16>
    %33 = vector.shape_cast %32 : vector<8x16x8xbf16> to vector<128x8xbf16>
    %c3 = arith.constant 3 : index
    %c0_21 = arith.constant 0 : index
    %c0_22 = arith.constant 0 : index
    %34 = vector.load %arg5[%c3, %c0_21, %c0_22] : memref<9x8x8xbf16, #tpu.memory_space<vmem>>, vector<1x8x8xbf16>
    %35 = vector.shape_cast %34 : vector<1x8x8xbf16> to vector<8x8xbf16>
    %cst_23 = arith.constant dense<0.000000e+00> : vector<128x8xf32>
    %36 = tpu.matmul %33, %35, %cst_23 {dimension_numbers = #tpu.dot_dimension_numbers<[1], [0], [0], [1], [0, 0, 1, 1], [], []>} : vector<128x8xbf16>, vector<8x8xbf16>, vector<128x8xf32> -> vector<128x8xf32>
    %37 = arith.addf %31, %36 : vector<128x8xf32>
    %38 = vector.extract_strided_slice %6 {offsets = [1, 0, 0], sizes = [8, 16, 8], strides = [1, 1, 1]} : vector<10x16x8xbf16> to vector<8x16x8xbf16>
    %39 = vector.shape_cast %38 : vector<8x16x8xbf16> to vector<128x8xbf16>
    %c4 = arith.constant 4 : index
    %c0_24 = arith.constant 0 : index
    %c0_25 = arith.constant 0 : index
    %40 = vector.load %arg5[%c4, %c0_24, %c0_25] : memref<9x8x8xbf16, #tpu.memory_space<vmem>>, vector<1x8x8xbf16>
    %41 = vector.shape_cast %40 : vector<1x8x8xbf16> to vector<8x8xbf16>
    %cst_26 = arith.constant dense<0.000000e+00> : vector<128x8xf32>
    %42 = tpu.matmul %39, %41, %cst_26 {dimension_numbers = #tpu.dot_dimension_numbers<[1], [0], [0], [1], [0, 0, 1, 1], [], []>} : vector<128x8xbf16>, vector<8x8xbf16>, vector<128x8xf32> -> vector<128x8xf32>
    %43 = arith.addf %37, %42 : vector<128x8xf32>
    %44 = vector.extract_strided_slice %12 {offsets = [1, 0, 0], sizes = [8, 16, 8], strides = [1, 1, 1]} : vector<10x16x8xbf16> to vector<8x16x8xbf16>
    %45 = vector.shape_cast %44 : vector<8x16x8xbf16> to vector<128x8xbf16>
    %c5 = arith.constant 5 : index
    %c0_27 = arith.constant 0 : index
    %c0_28 = arith.constant 0 : index
    %46 = vector.load %arg5[%c5, %c0_27, %c0_28] : memref<9x8x8xbf16, #tpu.memory_space<vmem>>, vector<1x8x8xbf16>
    %47 = vector.shape_cast %46 : vector<1x8x8xbf16> to vector<8x8xbf16>
    %cst_29 = arith.constant dense<0.000000e+00> : vector<128x8xf32>
    %48 = tpu.matmul %45, %47, %cst_29 {dimension_numbers = #tpu.dot_dimension_numbers<[1], [0], [0], [1], [0, 0, 1, 1], [], []>} : vector<128x8xbf16>, vector<8x8xbf16>, vector<128x8xf32> -> vector<128x8xf32>
    %49 = arith.addf %43, %48 : vector<128x8xf32>
    %50 = vector.extract_strided_slice %9 {offsets = [2, 0, 0], sizes = [8, 16, 8], strides = [1, 1, 1]} : vector<10x16x8xbf16> to vector<8x16x8xbf16>
    %51 = vector.shape_cast %50 : vector<8x16x8xbf16> to vector<128x8xbf16>
    %c6 = arith.constant 6 : index
    %c0_30 = arith.constant 0 : index
    %c0_31 = arith.constant 0 : index
    %52 = vector.load %arg5[%c6, %c0_30, %c0_31] : memref<9x8x8xbf16, #tpu.memory_space<vmem>>, vector<1x8x8xbf16>
    %53 = vector.shape_cast %52 : vector<1x8x8xbf16> to vector<8x8xbf16>
    %cst_32 = arith.constant dense<0.000000e+00> : vector<128x8xf32>
    %54 = tpu.matmul %51, %53, %cst_32 {dimension_numbers = #tpu.dot_dimension_numbers<[1], [0], [0], [1], [0, 0, 1, 1], [], []>} : vector<128x8xbf16>, vector<8x8xbf16>, vector<128x8xf32> -> vector<128x8xf32>
    %55 = arith.addf %49, %54 : vector<128x8xf32>
    %56 = vector.extract_strided_slice %6 {offsets = [2, 0, 0], sizes = [8, 16, 8], strides = [1, 1, 1]} : vector<10x16x8xbf16> to vector<8x16x8xbf16>
    %57 = vector.shape_cast %56 : vector<8x16x8xbf16> to vector<128x8xbf16>
    %c7 = arith.constant 7 : index
    %c0_33 = arith.constant 0 : index
    %c0_34 = arith.constant 0 : index
    %58 = vector.load %arg5[%c7, %c0_33, %c0_34] : memref<9x8x8xbf16, #tpu.memory_space<vmem>>, vector<1x8x8xbf16>
    %59 = vector.shape_cast %58 : vector<1x8x8xbf16> to vector<8x8xbf16>
    %cst_35 = arith.constant dense<0.000000e+00> : vector<128x8xf32>
    %60 = tpu.matmul %57, %59, %cst_35 {dimension_numbers = #tpu.dot_dimension_numbers<[1], [0], [0], [1], [0, 0, 1, 1], [], []>} : vector<128x8xbf16>, vector<8x8xbf16>, vector<128x8xf32> -> vector<128x8xf32>
    %61 = arith.addf %55, %60 : vector<128x8xf32>
    %62 = vector.extract_strided_slice %12 {offsets = [2, 0, 0], sizes = [8, 16, 8], strides = [1, 1, 1]} : vector<10x16x8xbf16> to vector<8x16x8xbf16>
    %63 = vector.shape_cast %62 : vector<8x16x8xbf16> to vector<128x8xbf16>
    %c8 = arith.constant 8 : index
    %c0_36 = arith.constant 0 : index
    %c0_37 = arith.constant 0 : index
    %64 = vector.load %arg5[%c8, %c0_36, %c0_37] : memref<9x8x8xbf16, #tpu.memory_space<vmem>>, vector<1x8x8xbf16>
    %65 = vector.shape_cast %64 : vector<1x8x8xbf16> to vector<8x8xbf16>
    %cst_38 = arith.constant dense<0.000000e+00> : vector<128x8xf32>
    %66 = tpu.matmul %63, %65, %cst_38 {dimension_numbers = #tpu.dot_dimension_numbers<[1], [0], [0], [1], [0, 0, 1, 1], [], []>} : vector<128x8xbf16>, vector<8x8xbf16>, vector<128x8xf32> -> vector<128x8xf32>
    %67 = arith.addf %61, %66 : vector<128x8xf32>
    %c0_39 = arith.constant 0 : index
    %c0_40 = arith.constant 0 : index
    %68 = vector.load %arg6[%c0_39, %c0_40] : memref<1x8xf32, #tpu.memory_space<vmem>>, vector<1x8xf32>
    %69 = vector.broadcast %68 : vector<1x8xf32> to vector<128x8xf32>
    %70 = arith.addf %67, %69 : vector<128x8xf32>
    %cst_41 = arith.constant 0.000000e+00 : f32
    %71 = vector.broadcast %cst_41 : f32 to vector<128x8xf32>
    %72 = arith.cmpf oge, %70, %71 : vector<128x8xf32>
    %cst_42 = arith.constant 0.00999999977 : f32
    %73 = vector.broadcast %cst_42 : f32 to vector<128x8xf32>
    %74 = arith.mulf %73, %70 : vector<128x8xf32>
    %75 = arith.select %72, %70, %74 : vector<128x8xi1>, vector<128x8xf32>
    %76 = vector.shape_cast %75 : vector<128x8xf32> to vector<8x16x8xf32>
    %c0_43 = arith.constant 0 : index
    %c0_44 = arith.constant 0 : index
    %c0_45 = arith.constant 0 : index
    %c0_46 = arith.constant 0 : index
    %77 = vector.load %arg7[%c0_43, %c0_44, %c0_45, %c0_46] : memref<1x8x16x8xf32, #tpu.memory_space<vmem>>, vector<1x8x16x8xf32>
    %78 = vector.shape_cast %77 : vector<1x8x16x8xf32> to vector<8x16x8xf32>
    %79 = vector.shape_cast %76 : vector<8x16x8xf32> to vector<1x8x16x8xf32>
    tpu.vector_store %arg7[%c0_43, %c0_44, %c0_45, %c0_46], %79 {strides = array<i32>} : memref<1x8x16x8xf32, #tpu.memory_space<vmem>>, vector<1x8x16x8xf32>,
    return
  }
  func.func @transform_0(%arg0: i32, %arg1: i32) -> (i32, i32, i32, i32) {
    %c0_i32 = arith.constant 0 : i32
    %c0_i32_0 = arith.constant 0 : i32
    %c0_i32_1 = arith.constant 0 : i32
    return %arg0, %arg1, %c0_i32, %c0_i32_0 : i32, i32, i32, i32
  }
  func.func @transform_1(%arg0: i32, %arg1: i32) -> (i32, i32, i32, i32) {
    %c0_i32 = arith.constant 0 : i32
    %c0_i32_0 = arith.constant 0 : i32
    %c0_i32_1 = arith.constant 0 : i32
    return %arg0, %arg1, %c0_i32, %c0_i32_0 : i32, i32, i32, i32
  }
  func.func @transform_2(%arg0: i32, %arg1: i32) -> (i32, i32, i32, i32) {
    %c0_i32 = arith.constant 0 : i32
    %c0_i32_0 = arith.constant 0 : i32
    %c0_i32_1 = arith.constant 0 : i32
    return %arg0, %arg1, %c0_i32, %c0_i32_0 : i32, i32, i32, i32
  }
  func.func @transform_3(%arg0: i32, %arg1: i32) -> (i32, i32, i32) {
    %c0_i32 = arith.constant 0 : i32
    %c0_i32_0 = arith.constant 0 : i32
    %c0_i32_1 = arith.constant 0 : i32
    %c0_i32_2 = arith.constant 0 : i32
    return %c0_i32, %c0_i32_0, %c0_i32_1 : i32, i32, i32
  }
  func.func @transform_4(%arg0: i32, %arg1: i32) -> (i32, i32) {
    %c0_i32 = arith.constant 0 : i32
    %c0_i32_0 = arith.constant 0 : i32
    %c0_i32_1 = arith.constant 0 : i32
    return %c0_i32, %c0_i32_0 : i32, i32
  }
  func.func @transform_5(%arg0: i32, %arg1: i32) -> (i32, i32, i32, i32) {
    %c0_i32 = arith.constant 0 : i32
    %c0_i32_0 = arith.constant 0 : i32
    %c0_i32_1 = arith.constant 0 : i32
    return %arg0, %arg1, %c0_i32, %c0_i32_0 : i32, i32, i32, i32
  }
}

</mosaic_0001>

<bundles_post_ra>
// kernel: conv_block_forward.2
= control target key start
LH: loop header
LB: loop body
LE: loop exit
PB: predicated region body
PF: predicated region fallthrough
CT: control target
= control target key end

     0   :  { %s2617_s18 = smov 0   ;;  %s2619_s19 = smov 0   ;;  %s3349_s0 = inlined_call_operand.vmem [shape: bf16[2,2,16,4], index: 0, kind: input, shape index: {}]   ;;  %s3350_s1 = inlined_call_operand.vmem [shape: bf16[2,16,16,4], index: 1, kind: input, shape index: {}]   ;;  %s3351_s2 = inlined_call_operand.vmem [shape: bf16[2,2,16,4], index: 2, kind: input, shape index: {}]   ;;  %s3352_s3 = inlined_call_operand.vmem [shape: bf16[9,4,8], index: 3, kind: input, shape index: {}]   ;;  %s3353_s4 = inlined_call_operand.vmem [shape: f32[1,8], index: 4, kind: input, shape index: {}]   ;;  %s3354_s5 = inlined_call_operand.vmem [shape: bf16[2,16,16,8], index: 5, kind: output, shape index: {}]  }
   0x1   :  { %s2621_s20 = smov 0   ;;  %s2623_s21 = smov 0  }
   0x2   :  { %s2625_s22 = smov 0  }
   0x3 LB: > { %s24_s23 = sadd.s32 1, %s2577_s20  ;;  %s27_s24 = sadd.s32 1, %s2581_s21  ;;  %s2585_s22 = sphi %s2625_s22, %s15_s22   ;;  %s2581_s21 = sphi %s2623_s21, %s3402_s21   ;;  %s2577_s20 = sphi %s2621_s20, %s3401_s20   ;;  %s2573_s19 = sphi %s2619_s19, %s3400_s19   ;;  %s2569_s18 = sphi %s2617_s18, %s3399_s18  }
   0x4   : > { %p25_p0 = scmp.ge.s32.totalorder %s24_s23, 2  ;;  %p2062_p1 = scmp.ge.s32.totalorder %s2585_s22, 1 }
   0x5   : > { %p241_p2 = scmp.lt.s32.totalorder %s2585_s22, 5 }
   0x6   : > { %s3404_s23 = smov (%p25_p0, %s24_s23), 0  ;;  %s3406_s24 = smov (!%p25_p0, %s27_s24), %s2581_s21 }
   0x7   : > { %p242_p3 = pnand %p2062_p1, %p241_p2  ;;  %p29_p4 = scmp.ge.s32.totalorder %s3406_s24, 2 }
   0x9   : > { %s3408_s24 = smov (%p29_p4, %s3406_s24), 0  ;;  %245 = sbr.rel (%p242_p3) target bundleno = 378 (0x17a), region = 40 }
   0xe   : > { %v2107_v0 = vld [vmem:[%s3352_s3 + $0x2] sm:$0x3]  ;;  %vm674_vm0 = vcmask 1041408   ;;  %p297_p5 = scmp.lt.s32.totalorder %s2573_s19, 1  ;;  %p299_p6 = scmp.lt.s32.totalorder %s2569_s18, 1  ;;  %vm657_vm1 = vcmask 31744  }
   0xf   : > { %2467 = vmatprep.subr.msk.bf16.mxu0 %vm674_vm0, %v2107_v0  ;;  %2468 = vmatprep.subr.msk.bf16.mxu1 %vm674_vm0, %v2107_v0  ;;  %v676_v1 = vsel %vm674_vm0, %v2107_v0, 0  ;;  %s2066_s27 = sshll.u32 %s2569_s18, 3  ;;  %v654_v2 = vld [vmem:[%s3352_s3] sm:$0x3]  ;;  %v2124_v3 = vld [vmem:[%s3352_s3 + $0x4] sm:$0x3] }
  0x10   : > { %2304 = vmatpush3.bf16.msra.mxu0 %v676_v1  ;;  %2466 = vmatpush3.bf16.msra.mxu1 %v676_v1  ;;  %s3410_s19 = smov (!%p297_p5, %s2573_s19), 1  ;;  %s3412_s18 = smov (!%p299_p6, %s2569_s18), 1  ;;  %v800_v9 = vsel %vm674_vm0, %v654_v2, 0  ;;  %v926_v10 = vsel %vm674_vm0, %v2124_v3, 0  ;;  %vm641_vm2 = vcmask 1047552   ;;  %vm538_vm4 = vcmask 1040384  }
  0x11   : > { %2469 = vmatprep.subr.msk.bf16.mxu1 %vm674_vm0, %v654_v2  ;;  %2470 = vmatprep.subr.msk.bf16.mxu0 %vm674_vm0, %v2124_v3  ;;  %s2064_s7 = sshll.u32 %s3410_s19, 2  ;;  %s2063_s8 = sshll.u32 %s3412_s18, 1  ;;  %vm642_vm3 = vsmask.f32 7424  ;;  %v2133_v17 = vld [vmem:[%s3352_s3 + $0x6] sm:$0x3] }
  0x12   : > { %p309_p7 = scmp.lt.s32.totalorder %s2066_s27, 15  ;;  %s2666_s9 = sadd.s32 %s2064_s7, %s2063_s8  ;;  %v2142_v27 = vld [vmem:[%s3352_s3 + $0x8] sm:$0x3]  ;;  %vm2757_vm5 = vmand %vm641_vm2, %vm642_vm3  ;;  %vm539_vm6 = vsmask.f32 256  ;;  %v2763_v41 = vsel %vm674_vm0, %v2133_v17, 0 }
  0x13   : > { %s2065_s10 = sshll.u32 %s2666_s9, 2  ;;  %s2068_s14 = sshll.u32 %s3410_s19, 5  ;;  %v1167_v50 = vsel %vm674_vm0, %v2142_v27, 0  ;;  %vm2791_vm7 = vmand %vm538_vm4, %vm539_vm6  ;;  %v2178_v39 = vld [vmem:[%s3352_s3 + $0x10] sm:$0x3]  ;;  %vm1900_vm8 = vcmask 60416  }
  0x14   : > { %s305_s13 = scalar_lea.vmem %s3349_s0, %s2065_s10  ;;  %s3414_s27 = smov (!%p309_p7, %s2066_s27), 15 }
  0x15   : > { %v338_v4 = vld [vmem:[%s305_s13] sm:$0xf]  ;;  %v339_v5 = vld [vmem:[%s305_s13 + $0x4] sm:$0xf]  ;;  %s2067_s15 = sshll.u32 %s3414_s27, 1  ;;  %s325_s7 = scalar_lea.vmem %s3351_s2, %s2065_s10 }
  0x16   : > { %v2087_v6 = vcombine.low %v338_v4, %v339_v5  ;;  %v2097_v7 = vcombine.low %v339_v5, %v339_v5  ;;  %s2674_s16 = sadd.s32 %s2068_s14, %s2067_s15  ;;  %v2077_v22 = vcombine.low %v338_v4, %v338_v4  ;;  %v2781_v51 = vld [vmem:[%s325_s7] sm:$0xf]  ;;  %v2783_v52 = vld [vmem:[%s325_s7 + $0x4] sm:$0xf] }
  0x17   : > { %s2069_s17 = sshll.u32 %s2674_s16, 2  ;;  %v2804_v2 = vcombine.low %v2781_v51, %v2783_v52 }
  0x18   : > { %v462_v8 = vshll.u32 %v2087_v6, 16  ;;  %2305 = vmatprep.mubr.msk.bf16.mxu0 %vm657_vm1, %v2087_v6  ;;  %s2685_s25 = scalar_lea.vmem %s3350_s1, %s2069_s17  ;;  %v459_v11 = vshrl.u32 %v2087_v6, 16  ;;  %v592_v12 = vshll.u32 %v2097_v7, 16  ;;  %v389_v47 = vshrl.u32 %v2077_v22, 16  ;;  %s3268_s27 = scalar_lea.vmem %s3354_s5, %s2069_s17 }
  0x19   : > { %v2688_v14 = vld [vmem:[%s2685_s25] sm:$0xf]  ;;  %v341_v15 = vld [vmem:[%s2685_s25 + $0x4] sm:$0xf]  ;;  %v2692_v16 = vld [vmem:[%s2685_s25 + $0x18] sm:$0xf] }
  0x1a   : > { %v551_v13 = vrot.slane %v462_v8, 1  ;;  %v2698_v18 = vcombine.low %v2688_v14, %v341_v15  ;;  %v2701_v19 = vld [vmem:[%s2685_s25 + $0x1c] sm:$0xf]  ;;  %v2704_v20 = vld [vmem:[%s2685_s25 + $0x20] sm:$0xf]  ;;  %v594_v28 = vrot.slane %v592_v12, 4  ;;  %v2098_v33 = vcombine.low %v341_v15, %v341_v15 }
  0x1b   : > { %v2707_v21 = vld [vmem:[%s2685_s25 + $0x24] sm:$0xf]  ;;  %v2711_v23 = vcombine.low %v2692_v16, %v2701_v19  ;;  %v2718_v25 = vld [vmem:[%s2685_s25 + $0x8] sm:$0xf]  ;;  %v343_v26 = vld [vmem:[%s2685_s25 + $0xc] sm:$0xf]  ;;  %v2078_v53 = vcombine.low %v2688_v14, %v2688_v14  ;;  %v2101_v5 = vcombine.low %v2701_v19, %v2701_v19 }
  0x1c   : > { %v2715_v24 = vcombine.low %v2704_v20, %v2707_v21  ;;  %v469_v29 = vshll.u32 %v2698_v18, 16  ;;  %2306 = vmatmul.mubr.msk.bf16.vlgmr.msra.gmra.mxu0 %vm657_vm1, %v2698_v18  ;;  %v2728_v30 = vcombine.low %v2718_v25, %v343_v26  ;;  %v2731_v31 = vld [vmem:[%s2685_s25 + $0x10] sm:$0xf]  ;;  %v461_v32 = vrot.slane %v459_v11, 7  ;;  %v345_v34 = vld [vmem:[%s2685_s25 + $0x14] sm:$0xf] }
  0x1d   : > { %2313 = vmatprep.mubr.msk.bf16.mxu1 %vm657_vm1, %v2711_v23  ;;  %2340 = vmatpush3.bf16.msra.mxu0 %v926_v10  ;;  %v2737_v35 = vld [vmem:[%s2685_s25 + $0x28] sm:$0xf]  ;;  %v2740_v36 = vld [vmem:[%s2685_s25 + $0x2c] sm:$0xf]  ;;  %v552_v37 = vor.u32 %v551_v13, %v459_v11  ;;  %v466_v40 = vshrl.u32 %v2698_v18, 16  ;;  %v2099_v46 = vcombine.low %v343_v26, %v343_v26  ;;  %v2775_v48 = vcombine.low %v2731_v31, %v345_v34 }
  0x1e   : > { %2314 = vmatmul.mubr.msk.bf16.vlgmr.msra.gmra.mxu1 %vm657_vm1, %v2715_v24  ;;  %2309 = vmatprep.mubr.msk.bf16.mxu0 %vm657_vm1, %v2728_v30  ;;  %v2753_v38 = vcombine.low %v2737_v35, %v2740_v36  ;;  %v2766_v42 = vld [vmem:[%s2685_s25 + $0x30] sm:$0xf]  ;;  %v2769_v43 = vld [vmem:[%s2685_s25 + $0x34] sm:$0xf]  ;;  %v473_v44 = vshrl.u32 %v2728_v30, 16  ;;  %v476_v45 = vshll.u32 %v2728_v30, 16  ;;  %v464_v49 = vor.u32 %v462_v8, %v461_v32 }
  0x1f   : > { %2322 = vmatpush3.bf16.msra.mxu1 %v800_v9  ;;  %2472 = vmatprep.subr.msk.bf16.mxu0 %vm674_vm0, %v2142_v27  ;;  %v596_v54 = vshll.u32 %v2098_v33, 16  ;;  %v644_v55 = vsel %vm2757_vm5, %v552_v37, %v594_v28  ;;  %v553_v57 = vrot.slane %v469_v29, 1  ;;  %v2797_v58 = vcombine.low %v2766_v42, %v2769_v43 }
  0x20   : > { %2317 = vmatprep.mubr.msk.bf16.mxu1 %vm657_vm1, %v2753_v38  ;;  %2471 = vmatprep.subr.msk.bf16.mxu1 %vm674_vm0, %v2133_v17  ;;  %v468_v59 = vrot.slane %v466_v40, 7  ;;  %v555_v60 = vrot.slane %v476_v45, 1  ;;  %v600_v61 = vshll.u32 %v2099_v46, 16  ;;  %v2079_v62 = vcombine.low %v2718_v25, %v2718_v25 }
  0x21   : > { %v475_v63 = vrot.slane %v473_v44, 7  ;;  %v483_v0 = vshll.u32 %v2775_v48, 16  ;;  %v2100_v1 = vcombine.low %v345_v34, %v345_v34  ;;  %v541_v3 = vsel %vm2791_vm7, %v389_v47, %v464_v49  ;;  %v2848_v47 = vld [vmem:[%s3352_s3 + $0xc] sm:$0x3] }
  0x22   : > { %v480_v4 = vshrl.u32 %v2775_v48, 16  ;;  %v392_v6 = vshrl.u32 %v2078_v53, 16  ;;  %v598_v7 = vrot.slane %v596_v54, 4  ;;  %v554_v8 = vor.u32 %v553_v57, %v466_v40 }
  0x23   : > { %v487_v9 = vshrl.u32 %v2711_v23, 16  ;;  %v471_v10 = vor.u32 %v469_v29, %v468_v59  ;;  %v556_v11 = vor.u32 %v555_v60, %v473_v44  ;;  %v602_v12 = vrot.slane %v600_v61, 4  ;;  %v2860_v60 = vld [vmem:[%s3352_s3 + $0xa] sm:$0x3] }
  0x24   : > { %2310 = vmatmul.mubr.msk.bf16.gmra.mxu0 %vm657_vm1, %v2775_v48  ;;  %v490_v13 = vshll.u32 %v2711_v23, 16  ;;  %v395_v14 = vshrl.u32 %v2079_v62, 16  ;;  %v478_v15 = vor.u32 %v476_v45, %v475_v63  ;;  %v557_v17 = vrot.slane %v483_v0, 1 }
  0x25   : > { %2341 = vmatprep.mubr.msk.bf16.mxu0 %vm657_vm1, %v644_v55  ;;  %v604_v19 = vshll.u32 %v2100_v1, 16  ;;  %v2080_v22 = vcombine.low %v2731_v31, %v2731_v31  ;;  %v482_v25 = vrot.slane %v480_v4, 7  ;;  %v608_v26 = vshll.u32 %v2101_v5, 16  ;;  %v2875_v1 = vld [vmem:[%s2685_s25 + $0x38] sm:$0xf] }
  0x26   : > { %2318 = vmatmul.mubr.msk.bf16.gmra.mxu1 %vm657_vm1, %v2797_v58  ;;  %v2086_v27 = vcombine.low %v2781_v51, %v2781_v51  ;;  %v2825_v28 = vsel %vm2757_vm5, %v554_v8, %v598_v7  ;;  %v559_v29 = vrot.slane %v490_v13, 1  ;;  %v2081_v32 = vcombine.low %v2692_v16, %v2692_v16 }
  0x27   : > { %2323 = vmatprep.mubr.msk.bf16.mxu1 %vm657_vm1, %v541_v3  ;;  %v489_v33 = vrot.slane %v487_v9, 7  ;;  %v2831_v34 = vsel %vm2791_vm7, %v392_v6, %v471_v10  ;;  %v2835_v31 = vsel %vm2757_vm5, %v556_v11, %v602_v12  ;;  %v494_v37 = vshrl.u32 %v2715_v24, 16  ;;  %v355_v3 = vld [vmem:[%s2685_s25 + $0x3c] sm:$0xf] }
  0x28   : > { %v497_v40 = vshll.u32 %v2715_v24, 16  ;;  %v2841_v44 = vsel %vm2791_vm7, %v395_v14, %v478_v15  ;;  %v558_v45 = vor.u32 %v557_v17, %v480_v4  ;;  %v606_v46 = vrot.slane %v604_v19, 4 }
  0x29   : > { %v2102_v16 = vcombine.low %v2707_v21, %v2707_v21  ;;  %v398_v49 = vshrl.u32 %v2080_v22, 16  ;;  %v485_v51 = vor.u32 %v483_v0, %v482_v25  ;;  %v610_v53 = vrot.slane %v608_v26, 4 }
  0x2a   : > { %v504_v54 = vshll.u32 %v2753_v38, 16  ;;  %v560_v55 = vor.u32 %v559_v29, %v487_v9  ;;  %v401_v21 = vshrl.u32 %v2081_v32, 16  ;;  %v492_v57 = vor.u32 %v490_v13, %v489_v33 }
  0x2b   : > { %v2103_v59 = vcombine.low %v2740_v36, %v2740_v36  ;;  %v2082_v61 = vcombine.low %v2704_v20, %v2704_v20  ;;  %v496_v62 = vrot.slane %v494_v37, 7  ;;  %v2868_v63 = vshrl.u32 %v2086_v27, 16 }
  0x2c   : > { %2342 = vmatmul.mubr.msk.bf16.vlgmr.msra.gmra.mxu0 %vm657_vm1, %v2825_v28  ;;  %v612_v36 = vshll.u32 %v2102_v16, 16  ;;  %v501_v0 = vshrl.u32 %v2753_v38, 16  ;;  %v2880_v20 = vsel %vm2757_vm5, %v558_v45, %v606_v46  ;;  %v563_v4 = vrot.slane %v504_v54, 1 }
  0x2d   : > { %2376 = vmatpush3.bf16.msra.mxu0 %v1167_v50  ;;  %2345 = vmatprep.mubr.msk.bf16.mxu0 %vm657_vm1, %v2835_v31  ;;  %v561_v50 = vrot.slane %v497_v40, 1  ;;  %v522_v5 = vshrl.u32 %v2804_v2, 16  ;;  %v2888_v6 = vsel %vm2791_vm7, %v398_v49, %v485_v51  ;;  %v2892_v7 = vsel %vm2757_vm5, %v560_v55, %v610_v53 }
  0x2e   : > { %2324 = vmatmul.mubr.msk.bf16.vlgmr.msra.gmra.mxu1 %vm657_vm1, %v2831_v34  ;;  %2474 = vmatprep.subr.msk.bf16.mxu0 %vm674_vm0, %v2848_v47  ;;  %v2896_v8 = vsel %vm2791_vm7, %v401_v21, %v492_v57  ;;  %v616_v9 = vshll.u32 %v2103_v59, 16  ;;  %v404_v11 = vshrl.u32 %v2082_v61, 16  ;;  %v499_v12 = vor.u32 %v497_v40, %v496_v62 }
  0x2f   : > { %2358 = vmatpush3.bf16.msra.mxu1 %v2763_v41  ;;  %2327 = vmatprep.mubr.msk.bf16.mxu1 %vm657_vm1, %v2841_v44  ;;  %v525_v41 = vshll.u32 %v2804_v2, 16  ;;  %v562_v10 = vor.u32 %v561_v50, %v494_v37  ;;  %v2899_v13 = vcombine.low %v2875_v1, %v355_v3  ;;  %v614_v14 = vrot.slane %v612_v36, 4 }
  0x30   : > { %2473 = vmatprep.subr.msk.bf16.mxu1 %vm674_vm0, %v2860_v60  ;;  %v2083_v15 = vcombine.low %v2737_v35, %v2737_v35  ;;  %v503_v17 = vrot.slane %v501_v0, 7  ;;  %v511_v19 = vshll.u32 %v2797_v58, 16  ;;  %v564_v22 = vor.u32 %v563_v4, %v501_v0 }
  0x31   : > { %v518_v25 = vshll.u32 %v2899_v13, 16  ;;  %v524_v26 = vrot.slane %v522_v5, 7  ;;  %v2105_v27 = vcombine.low %v355_v3, %v355_v3  ;;  %v618_v29 = vrot.slane %v616_v9, 4 }
  0x32   : > { %v2104_v32 = vcombine.low %v2769_v43, %v2769_v43  ;;  %v569_v33 = vrot.slane %v525_v41, 1  ;;  %v2106_v35 = vcombine.low %v2783_v52, %v2783_v52  ;;  %v515_v37 = vshrl.u32 %v2899_v13, 16 }
  0x33   : > { %v2916_v40 = vor.u32 %v525_v41, %v524_v26  ;;  %v567_v45 = vrot.slane %v518_v25, 1  ;;  %v624_v46 = vshll.u32 %v2105_v27, 16  ;;  %v407_v16 = vshrl.u32 %v2083_v15, 16 }
  0x34   : > { %2346 = vmatmul.mubr.msk.bf16.gmra.mxu0 %vm657_vm1, %v2880_v20  ;;  %v508_v43 = vshrl.u32 %v2797_v58, 16  ;;  %v570_v49 = vor.u32 %v569_v33, %v522_v5  ;;  %v628_v51 = vshll.u32 %v2106_v35, 16  ;;  %v506_v52 = vor.u32 %v504_v54, %v503_v17 }
  0x35   : > { %2349 = vmatprep.mubr.msk.bf16.mxu0 %vm657_vm1, %v2892_v7  ;;  %v550_v53 = vsel %vm2791_vm7, %v2868_v63, %v2916_v40  ;;  %v568_v55 = vor.u32 %v567_v45, %v515_v37  ;;  %v626_v21 = vrot.slane %v624_v46, 4  ;;  %v2929_v57 = vsel %vm2757_vm5, %v562_v10, %v614_v14 }
  0x36   : > { %2328 = vmatmul.mubr.msk.bf16.gmra.mxu1 %vm657_vm1, %v2888_v6  ;;  %v565_v59 = vrot.slane %v511_v19, 1  ;;  %v620_v50 = vshll.u32 %v2104_v32, 16  ;;  %v630_v61 = vrot.slane %v628_v51, 4  ;;  %v2933_v62 = vsel %vm2757_vm5, %v564_v22, %v618_v29 }
  0x37   : > { %2331 = vmatprep.mubr.msk.bf16.mxu1 %vm657_vm1, %v2896_v8  ;;  %v2937_v54 = vsel %vm2757_vm5, %v568_v55, %v626_v21  ;;  %v546_v36 = vsel %vm2791_vm7, %v404_v11, %v499_v12  ;;  %v2084_v0 = vcombine.low %v2766_v42, %v2766_v42  ;;  %v510_v3 = vrot.slane %v508_v43, 7 }
  0x38   : > { %v2945_v4 = vsel %vm2757_vm5, %v570_v49, %v630_v61  ;;  %v547_v5 = vsel %vm2791_vm7, %v407_v16, %v506_v52  ;;  %v566_v41 = vor.u32 %v565_v59, %v508_v43  ;;  %v622_v9 = vrot.slane %v620_v50, 4 }
  0x39   : > { %v410_v42 = vshrl.u32 %v2084_v0, 16  ;;  %v513_v10 = vor.u32 %v511_v19, %v510_v3  ;;  %v1409_v14 = vsel %vm674_vm0, %v2848_v47, 0  ;;  %v1288_v15 = vsel %vm674_vm0, %v2860_v60, 0 }
  0x3a   : > { %v2957_v11 = vsel %vm2757_vm5, %v566_v41, %v622_v9  ;;  %v517_v47 = vrot.slane %v515_v37, 7 }
  0x3b   : > { %v548_v12 = vsel %vm2791_vm7, %v410_v42, %v513_v10 }
  0x3c   : > { %2350 = vmatmul.mubr.msk.bf16.gmra.mxu0 %vm657_vm1, %v2929_v57  ;;  %v520_v17 = vor.u32 %v518_v25, %v517_v47 }
  0x3d   : > { %2353 = vmatprep.mubr.msk.bf16.mxu0 %vm657_vm1, %v2933_v62 }
  0x3e   : > { %2332 = vmatmul.mubr.msk.bf16.gmra.mxu1 %vm657_vm1, %v546_v36 }
  0x3f   : > { %2335 = vmatprep.mubr.msk.bf16.mxu1 %vm657_vm1, %v547_v5 }
  0x44   : > { %2354 = vmatmul.mubr.msk.bf16.gmra.mxu0 %vm657_vm1, %v2957_v11 }
  0x45   : > { %2377 = vmatprep.mubr.msk.bf16.mxu0 %vm657_vm1, %v2698_v18  ;;  %v2169_v18 = vld [vmem:[%s3352_s3 + $0xe] sm:$0x3] }
  0x46   : > { %2336 = vmatmul.mubr.msk.bf16.gmra.mxu1 %vm657_vm1, %v548_v12  ;;  %v1529_v22 = vsel %vm674_vm0, %v2169_v18, 0 }
  0x47   : > { %2359 = vmatprep.mubr.msk.bf16.mxu1 %vm657_vm1, %v2831_v34  ;;  %v2085_v34 = vcombine.low %v2875_v1, %v2875_v1  ;;  %v1650_v1 = vsel %vm674_vm0, %v2178_v39, 0 }
  0x49   : > { %v413_v60 = vshrl.u32 %v2085_v34, 16 }
  0x4b   : > { %v549_v19 = vsel %vm2791_vm7, %v413_v60, %v520_v17 }
  0x4c   : > { %2378 = vmatmul.mubr.msk.bf16.vlgmr.msra.gmra.mxu0 %vm657_vm1, %v2728_v30 }
  0x4d   : > { %2412 = vmatpush3.bf16.msra.mxu0 %v1409_v14  ;;  %2381 = vmatprep.mubr.msk.bf16.mxu0 %vm657_vm1, %v2775_v48 }
  0x4e   : > { %2360 = vmatmul.mubr.msk.bf16.vlgmr.msra.gmra.mxu1 %vm657_vm1, %v2841_v44  ;;  %2476 = vmatprep.subr.msk.bf16.mxu0 %vm674_vm0, %v2178_v39 }
  0x4f   : > { %2394 = vmatpush3.bf16.msra.mxu1 %v1288_v15  ;;  %2363 = vmatprep.mubr.msk.bf16.mxu1 %vm657_vm1, %v2888_v6 }
  0x50   : > { %2475 = vmatprep.subr.msk.bf16.mxu1 %vm674_vm0, %v2169_v18 }
  0x54   : > { %2382 = vmatmul.mubr.msk.bf16.gmra.mxu0 %vm657_vm1, %v2711_v23 }
  0x55   : > { %2385 = vmatprep.mubr.msk.bf16.mxu0 %vm657_vm1, %v2715_v24 }
  0x56   : > { %2364 = vmatmul.mubr.msk.bf16.gmra.mxu1 %vm657_vm1, %v2896_v8 }
  0x57   : > { %2367 = vmatprep.mubr.msk.bf16.mxu1 %vm657_vm1, %v546_v36 }
  0x5c   : > { %2386 = vmatmul.mubr.msk.bf16.gmra.mxu0 %vm657_vm1, %v2753_v38 }
  0x5d   : > { %2389 = vmatprep.mubr.msk.bf16.mxu0 %vm657_vm1, %v2797_v58 }
  0x5e   : > { %2368 = vmatmul.mubr.msk.bf16.gmra.mxu1 %vm657_vm1, %v547_v5 }
  0x5f   : > { %2371 = vmatprep.mubr.msk.bf16.mxu1 %vm657_vm1, %v548_v12 }
  0x64   : > { %2390 = vmatmul.mubr.msk.bf16.gmra.mxu0 %vm657_vm1, %v2899_v13 }
  0x65   : > { %2413 = vmatprep.mubr.msk.bf16.mxu0 %vm657_vm1, %v2841_v44 }
  0x66   : > { %2372 = vmatmul.mubr.msk.bf16.gmra.mxu1 %vm657_vm1, %v549_v19 }
  0x67   : > { %2395 = vmatprep.mubr.msk.bf16.mxu1 %vm657_vm1, %v2825_v28 }
  0x6c   : > { %2414 = vmatmul.mubr.msk.bf16.vlgmr.msra.gmra.mxu0 %vm657_vm1, %v2888_v6 }
  0x6d   : > { %2448 = vmatpush3.bf16.msra.mxu0 %v1650_v1  ;;  %2417 = vmatprep.mubr.msk.bf16.mxu0 %vm657_vm1, %v2896_v8 }
  0x6e   : > { %2396 = vmatmul.mubr.msk.bf16.vlgmr.msra.gmra.mxu1 %vm657_vm1, %v2835_v31 }
  0x6f   : > { %2430 = vmatpush3.bf16.msra.mxu1 %v1529_v22  ;;  %2399 = vmatprep.mubr.msk.bf16.mxu1 %vm657_vm1, %v2880_v20 }
  0x74   : > { %2418 = vmatmul.mubr.msk.bf16.gmra.mxu0 %vm657_vm1, %v546_v36 }
  0x75   : > { %2421 = vmatprep.mubr.msk.bf16.mxu0 %vm657_vm1, %v547_v5 }
  0x76   : > { %2400 = vmatmul.mubr.msk.bf16.gmra.mxu1 %vm657_vm1, %v2892_v7 }
  0x77   : > { %2403 = vmatprep.mubr.msk.bf16.mxu1 %vm657_vm1, %v2929_v57 }
  0x7c   : > { %2422 = vmatmul.mubr.msk.bf16.gmra.mxu0 %vm657_vm1, %v548_v12 }
  0x7d   : > { %2425 = vmatprep.mubr.msk.bf16.mxu0 %vm657_vm1, %v549_v19 }
  0x7e   : > { %2404 = vmatmul.mubr.msk.bf16.gmra.mxu1 %vm657_vm1, %v2933_v62 }
  0x7f   : > { %2407 = vmatprep.mubr.msk.bf16.mxu1 %vm657_vm1, %v2957_v11 }
  0x84   : > { %2426 = vmatmul.mubr.msk.bf16.gmra.mxu0 %vm657_vm1, %v550_v53 }
  0x85   : > { %2449 = vmatprep.mubr.msk.bf16.mxu0 %vm657_vm1, %v2835_v31 }
  0x86   : > { %2408 = vmatmul.mubr.msk.bf16.gmra.mxu1 %vm657_vm1, %v2937_v54 }
  0x87   : > { %2431 = vmatprep.mubr.msk.bf16.mxu1 %vm657_vm1, %v2728_v30 }
  0x8c   : > { %2450 = vmatmul.mubr.msk.bf16.vlgmr.msra.gmra.mxu0 %vm657_vm1, %v2880_v20 }
  0x8d   : > { %2453 = vmatprep.mubr.msk.bf16.mxu0 %vm657_vm1, %v2892_v7 }
  0x8e   : > { %2432 = vmatmul.mubr.msk.bf16.vlgmr.msra.gmra.mxu1 %vm657_vm1, %v2775_v48 }
  0x8f   : > { %2435 = vmatprep.mubr.msk.bf16.mxu1 %vm657_vm1, %v2711_v23 }
  0x94   : > { %2454 = vmatmul.mubr.msk.bf16.gmra.mxu0 %vm657_vm1, %v2929_v57 }
  0x95   : > { %2457 = vmatprep.mubr.msk.bf16.mxu0 %vm657_vm1, %v2933_v62 }
  0x96   : > { %2436 = vmatmul.mubr.msk.bf16.gmra.mxu1 %vm657_vm1, %v2715_v24 }
  0x97   : > { %2439 = vmatprep.mubr.msk.bf16.mxu1 %vm657_vm1, %v2753_v38 }
  0x9c   : > { %2458 = vmatmul.mubr.msk.bf16.gmra.mxu0 %vm657_vm1, %v2957_v11 }
  0x9d   : > { %2461 = vmatprep.mubr.msk.bf16.mxu0 %vm657_vm1, %v2937_v54 }
  0x9e   : > { %2440 = vmatmul.mubr.msk.bf16.gmra.mxu1 %vm657_vm1, %v2797_v58 }
  0x9f   : > { %2443 = vmatprep.mubr.msk.bf16.mxu1 %vm657_vm1, %v2899_v13 }
  0xa4   : > { %2462 = vmatmul.mubr.msk.bf16.gmra.mxu0 %vm657_vm1, %v2945_v4 }
  0xa6   : > { %2444 = vmatmul.mubr.msk.bf16.gmra.mxu1 %vm657_vm1, %v2804_v2 }
  0xdc   : > { %v2307_v23 = vpop.f32.mrf.mxu0 }
  0xde   : > { %v2315_v24 = vpop.f32.mrf.mxu1  ;;  %v712_v30 = vpop.f32.mrf.mxu0 }
  0xe0   : > { %v744_v38 = vpop.f32.mrf.mxu1  ;;  %v2308_v48 = vpop.f32.mrf.mxu0 }
  0xe2   : > { %v2316_v56 = vpop.f32.mrf.mxu1  ;;  %v715_v28 = vpop.f32.mrf.mxu0 }
  0xe4   : > { %v747_v31 = vpop.f32.mrf.mxu1  ;;  %v2311_v44 = vpop.f32.mrf.mxu0 }
  0xe6   : > { %v2319_v63 = vpop.f32.mrf.mxu1  ;;  %v728_v58 = vpop.f32.mrf.mxu0 }
  0xe8   : > { %v760_v20 = vpop.f32.mrf.mxu1  ;;  %v2312_v6 = vpop.f32.mrf.mxu0 }
  0xea   : > { %v2320_v7 = vpop.f32.mrf.mxu1  ;;  %v731_v8 = vpop.f32.mrf.mxu0 }
  0xec   : > { %v3076_v13 = vpop.f32.mrf.mxu1  ;;  %v2343_v25 = vpop.f32.mrf.mxu0 }
  0xee   : > { %v2325_v26 = vpop.f32.mrf.mxu1  ;;  %v962_v2 = vpop.f32.mrf.mxu0 }
  0xef   : > { %v845_v27 = vadd.f32 %v2325_v26, %v2307_v23 }
  0xf0   : > { %v836_v29 = vpop.f32.mrf.mxu1  ;;  %v2344_v32 = vpop.f32.mrf.mxu0 }
  0xf1   : > { %v837_v33 = vadd.f32 %v836_v29, %v712_v30  ;;  %v3078_v35 = vadd.f32 %v2343_v25, %v845_v27 }
  0xf2   : > { %v2326_v37 = vpop.f32.mrf.mxu1  ;;  %v965_v40 = vpop.f32.mrf.mxu0 }
  0xf3   : > { %v848_v45 = vadd.f32 %v2326_v37, %v2308_v48  ;;  %v3080_v46 = vadd.f32 %v962_v2, %v837_v33 }
  0xf4   : > { %v839_v16 = vpop.f32.mrf.mxu1  ;;  %v2347_v43 = vpop.f32.mrf.mxu0 }
  0xf5   : > { %v840_v49 = vadd.f32 %v839_v16, %v715_v28  ;;  %v3082_v51 = vadd.f32 %v2344_v32, %v848_v45 }
  0xf6   : > { %v2329_v52 = vpop.f32.mrf.mxu1  ;;  %v978_v53 = vpop.f32.mrf.mxu0 }
  0xf7   : > { %v861_v55 = vadd.f32 %v2329_v52, %v2311_v44  ;;  %v3084_v21 = vadd.f32 %v965_v40, %v840_v49 }
  0xf8   : > { %v852_v57 = vpop.f32.mrf.mxu1  ;;  %v2348_v59 = vpop.f32.mrf.mxu0 }
  0xf9   : > { %v853_v50 = vadd.f32 %v852_v57, %v728_v58  ;;  %v3086_v61 = vadd.f32 %v2347_v43, %v861_v55 }
  0xfa   : > { %v2330_v62 = vpop.f32.mrf.mxu1  ;;  %v981_v54 = vpop.f32.mrf.mxu0 }
  0xfb   : > { %v864_v36 = vadd.f32 %v2330_v62, %v2312_v6  ;;  %v3088_v0 = vadd.f32 %v978_v53, %v853_v50 }
  0xfc   : > { %v855_v3 = vpop.f32.mrf.mxu1  ;;  %v2351_v4 = vpop.f32.mrf.mxu0 }
  0xfd   : > { %v856_v5 = vadd.f32 %v855_v3, %v731_v8  ;;  %v3090_v41 = vadd.f32 %v2348_v59, %v864_v36 }
  0xfe   : > { %v2333_v9 = vpop.f32.mrf.mxu1  ;;  %v994_v42 = vpop.f32.mrf.mxu0 }
  0xff   : > { %v877_v10 = vadd.f32 %v2333_v9, %v2315_v24  ;;  %v3092_v11 = vadd.f32 %v981_v54, %v856_v5 }
 0x100   : > { %v868_v12 = vpop.f32.mrf.mxu1  ;;  %v2352_v14 = vpop.f32.mrf.mxu0 }
 0x101   : > { %v869_v39 = vadd.f32 %v868_v12, %v744_v38  ;;  %v3094_v15 = vadd.f32 %v2351_v4, %v877_v10 }
 0x102   : > { %v2334_v18 = vpop.f32.mrf.mxu1  ;;  %v997_v34 = vpop.f32.mrf.mxu0 }
 0x103   : > { %v880_v47 = vadd.f32 %v2334_v18, %v2316_v56  ;;  %v3096_v60 = vadd.f32 %v994_v42, %v869_v39 }
 0x104   : > { %v871_v17 = vpop.f32.mrf.mxu1  ;;  %v2355_v19 = vpop.f32.mrf.mxu0 }
 0x105   : > { %v872_v1 = vadd.f32 %v871_v17, %v747_v31  ;;  %v3098_v22 = vadd.f32 %v2352_v14, %v880_v47 }
 0x106   : > { %v2337_v23 = vpop.f32.mrf.mxu1  ;;  %v1010_v30 = vpop.f32.mrf.mxu0 }
 0x107   : > { %v893_v24 = vadd.f32 %v2337_v23, %v2319_v63  ;;  %v3100_v48 = vadd.f32 %v997_v34, %v872_v1 }
 0x108   : > { %v884_v28 = vpop.f32.mrf.mxu1  ;;  %v2356_v44 = vpop.f32.mrf.mxu0 }
 0x109   : > { %v885_v38 = vadd.f32 %v884_v28, %v760_v20  ;;  %v3102_v58 = vadd.f32 %v2355_v19, %v893_v24 }
 0x10a   : > { %v2338_v6 = vpop.f32.mrf.mxu1  ;;  %v1013_v8 = vpop.f32.mrf.mxu0 }
 0x10b   : > { %v896_v56 = vadd.f32 %v2338_v6, %v2320_v7  ;;  %v3104_v25 = vadd.f32 %v1010_v30, %v885_v38 }
 0x10c   : > { %v887_v26 = vpop.f32.mrf.mxu1  ;;  %v3106_v2 = vpop.f32.mrf.mxu0 }
 0x10d   : > { %v888_v31 = vadd.f32 %v887_v26, %v3076_v13  ;;  %v3109_v27 = vadd.f32 %v2356_v44, %v896_v56 }
 0x10e   : > { %v2361_v63 = vpop.f32.mrf.mxu1  ;;  %v3111_v29 = vpop.f32.mrf.mxu0 }
 0x10f   : > { %v3113_v32 = vadd.f32 %v1013_v8, %v888_v31 }
 0x110   : > { %v1083_v20 = vpop.f32.mrf.mxu1  ;;  %v3115_v33 = vpop.f32.mrf.mxu0 }
 0x112   : > { %v2362_v37 = vpop.f32.mrf.mxu1  ;;  %v3117_v40 = vpop.f32.mrf.mxu0 }
 0x114   : > { %v1086_v7 = vpop.f32.mrf.mxu1  ;;  %v3119_v45 = vpop.f32.mrf.mxu0 }
 0x116   : > { %v2365_v16 = vpop.f32.mrf.mxu1  ;;  %v3121_v43 = vpop.f32.mrf.mxu0 }
 0x118   : > { %v1099_v13 = vpop.f32.mrf.mxu1  ;;  %v3123_v49 = vpop.f32.mrf.mxu0 }
 0x11a   : > { %v2366_v52 = vpop.f32.mrf.mxu1  ;;  %v3125_v53 = vpop.f32.mrf.mxu0 }
 0x11c   : > { %v1102_v55 = vpop.f32.mrf.mxu1  ;;  %v3127_v57 = vpop.f32.mrf.mxu0 }
 0x11e   : > { %v2369_v59 = vpop.f32.mrf.mxu1  ;;  %v3129_v50 = vpop.f32.mrf.mxu0 }
 0x120   : > { %v1115_v62 = vpop.f32.mrf.mxu1  ;;  %v3131_v54 = vpop.f32.mrf.mxu0 }
 0x122   : > { %v2370_v36 = vpop.f32.mrf.mxu1  ;;  %v3133_v3 = vpop.f32.mrf.mxu0 }
 0x124   : > { %v1118_v4 = vpop.f32.mrf.mxu1  ;;  %v3135_v5 = vpop.f32.mrf.mxu0 }
 0x125   : > { %3359 = vst [vmem:[#allocation2_spill] sm:$0xff] %v3135_v5 }
 0x126   : > { %v2373_v9 = vpop.f32.mrf.mxu1  ;;  %v3137_v42 = vpop.f32.mrf.mxu0 }
 0x127   : > { %3360 = vst [vmem:[#allocation3_spill] sm:$0xff] %v3137_v42 }
 0x128   : > { %v3139_v10 = vpop.f32.mrf.mxu1  ;;  %v3141_v12 = vpop.f32.mrf.mxu0 }
 0x129   : > { %3361 = vst [vmem:[#allocation4_spill] sm:$0xff] %v3141_v12 }
 0x12a   : > { %v3143_v14 = vpop.f32.mrf.mxu1  ;;  %v3145_v39 = vpop.f32.mrf.mxu0 }
 0x12b   : > { %3362 = vst [vmem:[#allocation5_spill] sm:$0xff] %v3145_v39 }
 0x12c   : > { %v3147_v18 = vpop.f32.mrf.mxu1  ;;  %v2415_v34 = vpop.f32.mrf.mxu0 }
 0x12e   : > { %v2397_v47 = vpop.f32.mrf.mxu1  ;;  %v3149_v17 = vpop.f32.mrf.mxu0 }
 0x130   : > { %v1324_v19 = vpop.f32.mrf.mxu1  ;;  %v3151_v1 = vpop.f32.mrf.mxu0 }
 0x131   : > { %3363 = vst [vmem:[#allocation6_spill] sm:$0xff] %v3151_v1 }
 0x132   : > { %v2398_v23 = vpop.f32.mrf.mxu1  ;;  %v3153_v30 = vpop.f32.mrf.mxu0 }
 0x133   : > { %3364 = vst [vmem:[#allocation7_spill] sm:$0xff] %v3153_v30 }
 0x134   : > { %v3155_v24 = vpop.f32.mrf.mxu1  ;;  %v3157_v28 = vpop.f32.mrf.mxu0 }
 0x135   : > { %3365 = vst [vmem:[#allocation8_spill] sm:$0xff] %v3157_v28 }
 0x136   : > { %v2401_v44 = vpop.f32.mrf.mxu1  ;;  %v3159_v38 = vpop.f32.mrf.mxu0 }
 0x137   : > { %3366 = vst [vmem:[#allocation9_spill] sm:$0xff] %v3159_v38 }
 0x138   : > { %v1340_v6 = vpop.f32.mrf.mxu1  ;;  %v3161_v8 = vpop.f32.mrf.mxu0 }
 0x139   : > { %3367 = vst [vmem:[#allocation10_spill] sm:$0xff] %v3161_v8  ;;  %v1148_v8 = vadd.f32 %v2361_v63, %v3078_v35  ;;  %v1150_v35 = vadd.f32 %v1099_v13, %v3088_v0  ;;  %v1153_v63 = vadd.f32 %v2366_v52, %v3090_v41  ;;  %v1155_v41 = vadd.f32 %v1118_v4, %v3100_v48 }
 0x13a   : > { %v2402_v56 = vpop.f32.mrf.mxu1  ;;  %v3163_v26 = vpop.f32.mrf.mxu0  ;;  %v1160_v52 = vadd.f32 %v2373_v9, %v3102_v58 }
 0x13b   : > { %3368 = vst [vmem:[#allocation11_spill] sm:$0xff] %v3163_v26  ;;  %v3230_v58 = vadd.f32 %v3133_v3, %v1155_v41 }
 0x13c   : > { %v3165_v31 = vpop.f32.mrf.mxu1  ;;  %v3167_v39 = vpop.f32.mrf.mxu0 }
 0x13d   : > { %3369 = vst [vmem:[#allocation12_spill] sm:$0xff] %v3165_v31  ;;  %3370 = vst [vmem:[#allocation13_spill] sm:$0xff] %v3167_v39  ;;  %v1146_v39 = vadd.f32 %v1083_v20, %v3080_v46  ;;  %v1156_v20 = vadd.f32 %v2369_v59, %v3094_v15 }
 0x13e   : > { %v3169_v12 = vpop.f32.mrf.mxu1  ;;  %v3171_v30 = vpop.f32.mrf.mxu0  ;;  %v3388_v41 = vld [vmem:[#allocation9_spill] sm:$0xff] }
 0x13f   : > { %3371 = vst [vmem:[#allocation14_spill] sm:$0xff] %v3169_v12  ;;  %3372 = vst [vmem:[#allocation15_spill] sm:$0xff] %v3171_v30  ;;  %v1149_v30 = vadd.f32 %v2362_v37, %v3082_v51  ;;  %v1266_v51 = vadd.f32 %v3111_v29, %v1146_v39  ;;  %v1273_v29 = vadd.f32 %v3123_v49, %v1153_v63  ;;  %v3380_v39 = vld [vmem:[#allocation6_spill] sm:$0xff] }
 0x140   : > { %v3173_v42 = vpop.f32.mrf.mxu1  ;;  %v3175_v28 = vpop.f32.mrf.mxu0  ;;  %v1276_v48 = vadd.f32 %v3127_v57, %v1156_v20 }
 0x141   : > { %3373 = vst [vmem:[#allocation16_spill] sm:$0xff] %v3175_v28  ;;  %v1147_v28 = vadd.f32 %v1086_v7, %v3084_v21  ;;  %v1154_v21 = vadd.f32 %v1115_v62, %v3096_v60  ;;  %v1269_v37 = vadd.f32 %v3115_v33, %v1149_v30  ;;  %v1158_v33 = vadd.f32 %v3139_v10, %v3104_v25  ;;  %v3384_v30 = vld [vmem:[#allocation4_spill] sm:$0xff] }
 0x142   : > { %v3177_v1 = vpop.f32.mrf.mxu1  ;;  %v3179_v38 = vpop.f32.mrf.mxu0  ;;  %v1159_v62 = vadd.f32 %v3147_v18, %v3113_v32  ;;  %v1394_v9 = vadd.f32 %v2402_v56, %v1273_v29  ;;  %v3379_v32 = vld [vmem:[#allocation2_spill] sm:$0xff] }
 0x143   : > { %3374 = vst [vmem:[#allocation17_spill] sm:$0xff] %v3177_v1  ;;  %3375 = vst [vmem:[#allocation18_spill] sm:$0xff] %v3179_v38  ;;  %v1268_v1 = vadd.f32 %v3106_v2, %v1148_v8  ;;  %v1152_v38 = vadd.f32 %v2365_v16, %v3086_v61  ;;  %v1157_v2 = vadd.f32 %v2370_v36, %v3098_v22 }
 0x144   : > { %v3182_v5 = vpop.f32.mrf.mxu1  ;;  %v3184_v26 = vpop.f32.mrf.mxu0  ;;  %v1267_v7 = vadd.f32 %v3117_v40, %v1147_v28  ;;  %v1270_v16 = vadd.f32 %v3121_v43, %v1150_v35  ;;  %v1161_v40 = vadd.f32 %v3143_v14, %v3109_v27  ;;  %v3386_v35 = vld [vmem:[#allocation7_spill] sm:$0xff] }
 0x145   : > { %3376 = vst [vmem:[#allocation19_spill] sm:$0xff] %v3182_v5  ;;  %3377 = vst [vmem:[#allocation20_spill] sm:$0xff] %v3184_v26  ;;  %v1151_v26 = vadd.f32 %v1102_v55, %v3092_v11  ;;  %v1387_v11 = vadd.f32 %v1324_v19, %v1266_v51  ;;  %v1272_v15 = vadd.f32 %v3119_v45, %v1152_v38  ;;  %v3385_v38 = vld [vmem:[#allocation5_spill] sm:$0xff] }
 0x146   : > { %v3187_v31 = vpop.f32.mrf.mxu1  ;;  %v3189_v12 = vpop.f32.mrf.mxu0  ;;  %v1390_v55 = vadd.f32 %v2398_v23, %v1269_v37  ;;  %v1274_v45 = vadd.f32 %v3129_v50, %v1154_v21  ;;  %v1277_v43 = vadd.f32 %v3131_v54, %v1157_v2  ;;  %v1388_v25 = vadd.f32 %v3155_v24, %v1267_v7  ;;  %v3237_v50 = vld [vmem:[%s3353_s4] ss:$0 sm:$0xff]  ;;  %v3387_v21 = vld [vmem:[#allocation8_spill] sm:$0xff]  ;;  %v3389_v37 = vld [vmem:[#allocation10_spill] sm:$0xff] }
 0x147   : > { %3378 = vst [vmem:[#allocation21_spill] sm:$0xff] %v3189_v12  ;;  %v1389_v12 = vadd.f32 %v2397_v47, %v1268_v1  ;;  %v1271_v60 = vadd.f32 %v3125_v53, %v1151_v26  ;;  %v1508_v36 = vadd.f32 %v3149_v17, %v1387_v11  ;;  %v1393_v4 = vadd.f32 %v2401_v44, %v1272_v15  ;;  %v3382_v17 = vld [vmem:[#allocation14_spill] sm:$0xff]  ;;  %v3383_v1 = vld [vmem:[#allocation3_spill] sm:$0xff] }
 0x148   : > { %v3198_v5 = vpop.f32.mrf.mxu1  ;;  %v3200_v46 = vpop.f32.mrf.mxu0  ;;  %v1391_v27 = vadd.f32 %v1340_v6, %v1270_v16  ;;  %v1511_v18 = vadd.f32 %v3380_v39, %v1390_v55  ;;  %v1397_v19 = vadd.f32 %v3382_v17, %v1276_v48  ;;  %v3246_v23 = vadd.f32 %v3383_v1, %v1158_v33  ;;  %v3390_v48 = vld [vmem:[#allocation11_spill] sm:$0xff]  ;;  %v3391_v33 = vld [vmem:[#allocation13_spill] sm:$0xff] }
 0x149   : > { %v1510_v59 = vadd.f32 %v2415_v34, %v1389_v12  ;;  %v3240_v12 = vadd.f32 %v3379_v32, %v1160_v52  ;;  %v3381_v34 = vld [vmem:[#allocation12_spill] sm:$0xff]  ;;  %v3249_v24 = vadd.f32 %v3384_v30, %v1161_v40  ;;  %v3252_v6 = vadd.f32 %v3385_v38, %v1159_v62 }
 0x14a   : > { %v3206_v61 = vpop.f32.mrf.mxu1  ;;  %v3208_v0 = vpop.f32.mrf.mxu0  ;;  %v1392_v47 = vadd.f32 %v3381_v34, %v1271_v60  ;;  %v1509_v63 = vadd.f32 %v3386_v35, %v1388_v25  ;;  %v1514_v2 = vadd.f32 %v3387_v21, %v1393_v4  ;;  %v1512_v11 = vadd.f32 %v3388_v41, %v1391_v27  ;;  %v3393_v34 = vld [vmem:[#allocation15_spill] sm:$0xff] }
 0x14b   : > { %v1515_v7 = vadd.f32 %v3389_v37, %v1394_v9  ;;  %v1395_v60 = vadd.f32 %v3173_v42, %v1274_v45  ;;  %v1518_v40 = vadd.f32 %v3391_v33, %v1397_v19  ;;  %v3392_v42 = vld [vmem:[#allocation17_spill] sm:$0xff] }
 0x14c   : > { %v3217_v22 = vpop.f32.mrf.mxu1  ;;  %v2451_v13 = vpop.f32.mrf.mxu0  ;;  %v1398_v45 = vadd.f32 %v3392_v42, %v1277_v43 }
 0x14d   : > { %v1516_v43 = vadd.f32 %v3393_v34, %v1395_v60 }
 0x14e   : > { %v2433_v49 = vpop.f32.mrf.mxu1  ;;  %v1686_v53 = vpop.f32.mrf.mxu0 }
 0x14f   : > { %v1630_v57 = vadd.f32 %v2433_v49, %v1510_v59  ;;  %v1513_v59 = vadd.f32 %v3390_v48, %v1392_v47  ;;  %v3394_v47 = vld [vmem:[#allocation19_spill] sm:$0xff] }
 0x150   : > { %v1565_v54 = vpop.f32.mrf.mxu1  ;;  %v2452_v10 = vpop.f32.mrf.mxu0  ;;  %v1396_v17 = vadd.f32 %v3394_v47, %v3230_v58  ;;  %v1401_v58 = vadd.f32 %v3187_v31, %v3240_v12  ;;  %v3396_v31 = vld [vmem:[#allocation18_spill] sm:$0xff] }
 0x151   : > { %v1751_v3 = vadd.f32 %v2451_v13, %v1630_v57  ;;  %v1628_v14 = vadd.f32 %v1565_v54, %v1508_v36 }
 0x152   : > { %v2434_v28 = vpop.f32.mrf.mxu1  ;;  %v1689_v44 = vpop.f32.mrf.mxu0  ;;  %v1517_v12 = vadd.f32 %v3396_v31, %v1396_v17 }
 0x153   : > { %v1774_v8 = vadd.f32 %v3237_v50, %v1751_v3  ;;  %v1749_v56 = vadd.f32 %v1686_v53, %v1628_v14  ;;  %v1631_v26 = vadd.f32 %v2434_v28, %v1511_v18 }
 0x154   : > { %v1568_v20 = vpop.f32.mrf.mxu1  ;;  %v2455_v51 = vpop.f32.mrf.mxu0 }
 0x155   : > { %vm1790_vm9 = vcmp.ge.f32.partialorder %v1774_v8, 0.0  ;;  %v1806_v15 = vmul.f32 0.01, %v1774_v8  ;;  %v1772_v16 = vadd.f32 %v3237_v50, %v1749_v56  ;;  %v1752_v29 = vadd.f32 %v2452_v10, %v1631_v26 }
 0x156   : > { %v1629_v13 = vadd.f32 %v1568_v20, %v1509_v63  ;;  %v2437_v52 = vpop.f32.mrf.mxu1  ;;  %v1702_v55 = vpop.f32.mrf.mxu0  ;;  %v3395_v20 = vld [vmem:[#allocation16_spill] sm:$0xff] }
 0x157   : > { %v1822_v49 = vsel %vm1790_vm9, %v1774_v8, %v1806_v15  ;;  %vm1788_vm10 = vcmp.ge.f32.partialorder %v1772_v16, 0.0  ;;  %v1804_v53 = vmul.f32 0.01, %v1772_v16  ;;  %v1775_v62 = vadd.f32 %v3237_v50, %v1752_v29 }
 0x158   : > { %v2208_v57 = vpack.c.bf16 %v1822_v49, %v1822_v49  ;;  %v1750_v36 = vadd.f32 %v1689_v44, %v1629_v13  ;;  %v1634_v25 = vadd.f32 %v2437_v52, %v1514_v2  ;;  %v1581_v4 = vpop.f32.mrf.mxu1  ;;  %v2456_v27 = vpop.f32.mrf.mxu0 }
 0x159   : > { %v1820_v9 = vsel %vm1788_vm10, %v1772_v16, %v1804_v53  ;;  %vm1791_vm11 = vcmp.ge.f32.partialorder %v1775_v62, 0.0  ;;  %v1807_v54 = vmul.f32 0.01, %v1775_v62  ;;  %v1632_v10 = vadd.f32 %v1581_v4, %v1512_v11 }
 0x15a   : > { %1903 = vst.msk [vmem:[%s3268_s27 + $0x8] sm:$0xf] %vm1900_vm8, %v2208_v57  ;;  %v2206_v32 = vpack.c.bf16 %v1820_v9, %v1820_v9  ;;  %v1773_v3 = vadd.f32 %v3237_v50, %v1750_v36  ;;  %v1755_v14 = vadd.f32 %v2455_v51, %v1634_v25  ;;  %v2438_v39 = vpop.f32.mrf.mxu1  ;;  %v1705_v18 = vpop.f32.mrf.mxu0  ;;  %v1519_v51 = vadd.f32 %v3395_v20, %v1398_v45 }
 0x15b   : > { %v1823_v19 = vsel %vm1791_vm11, %v1775_v62, %v1807_v54  ;;  %v1753_v1 = vadd.f32 %v1702_v55, %v1632_v10  ;;  %v1635_v30 = vadd.f32 %v2438_v39, %v1515_v7  ;;  %v1402_v57 = vadd.f32 %v3206_v61, %v3249_v24 }
 0x15c   : > { %1901 = vst.msk [vmem:[%s3268_s27] sm:$0xf] %vm1900_vm8, %v2206_v32  ;;  %v2209_v28 = vpack.c.bf16 %v1823_v19, %v1823_v19  ;;  %vm1789_vm12 = vcmp.ge.f32.partialorder %v1773_v3, 0.0  ;;  %v1805_v44 = vmul.f32 0.01, %v1773_v3  ;;  %v1778_v38 = vadd.f32 %v3237_v50, %v1755_v14  ;;  %v1584_v8 = vpop.f32.mrf.mxu1  ;;  %v2459_v56 = vpop.f32.mrf.mxu0 }
 0x15d   : > { %v1776_v26 = vadd.f32 %v3237_v50, %v1753_v1  ;;  %v1756_v35 = vadd.f32 %v2456_v27, %v1635_v30  ;;  %v1633_v63 = vadd.f32 %v1584_v8, %v1513_v59  ;;  %v1400_v61 = vadd.f32 %v3217_v22, %v3252_v6 }
 0x15e   : > { %1904 = vst.msk [vmem:[%s3268_s27 + $0xc] sm:$0xf] %vm1900_vm8, %v2209_v28  ;;  %v1821_v21 = vsel %vm1789_vm12, %v1773_v3, %v1805_v44  ;;  %vm1794_vm13 = vcmp.ge.f32.partialorder %v1778_v38, 0.0  ;;  %v1810_v2 = vmul.f32 0.01, %v1778_v38  ;;  %v2441_v41 = vpop.f32.mrf.mxu1  ;;  %v1718_v11 = vpop.f32.mrf.mxu0  ;;  %v3398_v28 = vld [vmem:[#allocation21_spill] sm:$0xff]  ;;  %v1523_v6 = vadd.f32 %v3200_v46, %v1402_v57 }
 0x15f   : > { %v2207_v37 = vpack.c.bf16 %v1821_v21, %v1821_v21  ;;  %vm1792_vm14 = vcmp.ge.f32.partialorder %v1776_v26, 0.0  ;;  %v1808_v7 = vmul.f32 0.01, %v1776_v26  ;;  %v1779_v15 = vadd.f32 %v3237_v50, %v1756_v35 }
 0x160   : > { %v1826_v16 = vsel %vm1794_vm13, %v1778_v38, %v1810_v2  ;;  %v1754_v29 = vadd.f32 %v1705_v18, %v1633_v63  ;;  %v1638_v60 = vadd.f32 %v2441_v41, %v1518_v40  ;;  %v1597_v13 = vpop.f32.mrf.mxu1  ;;  %v2460_v52 = vpop.f32.mrf.mxu0  ;;  %v1399_v40 = vadd.f32 %v3198_v5, %v3246_v23  ;;  %v3397_v23 = vld [vmem:[#allocation20_spill] sm:$0xff] }
 0x161   : > { %1902 = vst.msk [vmem:[%s3268_s27 + $0x4] sm:$0xf] %vm1900_vm8, %v2207_v37  ;;  %v2212_v55 = vpack.c.bf16 %v1826_v16, %v1826_v16  ;;  %v1824_v48 = vsel %vm1792_vm14, %v1776_v26, %v1808_v7  ;;  %vm1795_vm15 = vcmp.ge.f32.partialorder %v1779_v15, 0.0  ;;  %v1811_v59 = vmul.f32 0.01, %v1779_v15 }
 0x162   : > { %v2210_v33 = vpack.c.bf16 %v1824_v48, %v1824_v48  ;;  %v1777_v49 = vadd.f32 %v3237_v50, %v1754_v29  ;;  %v1759_v53 = vadd.f32 %v2459_v56, %v1638_v60  ;;  %v1636_v62 = vadd.f32 %v1597_v13, %v1516_v43  ;;  %v2442_v42 = vpop.f32.mrf.mxu1  ;;  %v1721_v45 = vpop.f32.mrf.mxu0 }
 0x163   : > { %1907 = vst.msk [vmem:[%s3268_s27 + $0x18] sm:$0xf] %vm1900_vm8, %v2212_v55  ;;  %v1827_v36 = vsel %vm1795_vm15, %v1779_v15, %v1811_v59  ;;  %v1639_v25 = vadd.f32 %v2442_v42, %v1519_v51  ;;  %v1522_v14 = vadd.f32 %v3397_v23, %v1401_v58  ;;  %v1520_v44 = vadd.f32 %v3398_v28, %v1399_v40 }
 0x164   : > { %1905 = vst.msk [vmem:[%s3268_s27 + $0x10] sm:$0xf] %vm1900_vm8, %v2210_v33  ;;  %v2213_v4 = vpack.c.bf16 %v1827_v36, %v1827_v36  ;;  %vm1793_vm0 = vcmp.ge.f32.partialorder %v1777_v49, 0.0  ;;  %v1809_v27 = vmul.f32 0.01, %v1777_v49  ;;  %v1782_v9 = vadd.f32 %v3237_v50, %v1759_v53  ;;  %v1600_v54 = vpop.f32.mrf.mxu1  ;;  %v2463_v10 = vpop.f32.mrf.mxu0 }
 0x165   : > { %v1757_v32 = vadd.f32 %v1718_v11, %v1636_v62  ;;  %v1760_v3 = vadd.f32 %v2460_v52, %v1639_v25  ;;  %v1637_v5 = vadd.f32 %v1600_v54, %v1517_v12  ;;  %v1521_v46 = vadd.f32 %v3208_v0, %v1400_v61 }
 0x166   : > { %1908 = vst.msk [vmem:[%s3268_s27 + $0x1c] sm:$0xf] %vm1900_vm8, %v2213_v4  ;;  %v1825_v24 = vsel %vm1793_vm0, %v1777_v49, %v1809_v27  ;;  %vm1798_vm1 = vcmp.ge.f32.partialorder %v1782_v9, 0.0  ;;  %v1814_v39 = vmul.f32 0.01, %v1782_v9  ;;  %v2445_v18 = vpop.f32.mrf.mxu1  ;;  %v1734_v19 = vpop.f32.mrf.mxu0 }
 0x167   : > { %v2211_v34 = vpack.c.bf16 %v1825_v24, %v1825_v24  ;;  %v1780_v43 = vadd.f32 %v3237_v50, %v1757_v32  ;;  %v1783_v47 = vadd.f32 %v3237_v50, %v1760_v3  ;;  %v1758_v17 = vadd.f32 %v1721_v45, %v1637_v5 }
 0x168   : > { %v1830_v1 = vsel %vm1798_vm1, %v1782_v9, %v1814_v39  ;;  %v1642_v30 = vadd.f32 %v2445_v18, %v1522_v14  ;;  %v1613_v22 = vpop.f32.mrf.mxu1  ;;  %v2464_v58 = vpop.f32.mrf.mxu0 }
 0x169   : > { %1906 = vst.msk [vmem:[%s3268_s27 + $0x14] sm:$0xf] %vm1900_vm8, %v2211_v34  ;;  %v2216_v38 = vpack.c.bf16 %v1830_v1, %v1830_v1  ;;  %vm1796_vm2 = vcmp.ge.f32.partialorder %v1780_v43, 0.0  ;;  %v1812_v8 = vmul.f32 0.01, %v1780_v43  ;;  %vm1799_vm3 = vcmp.ge.f32.partialorder %v1783_v47, 0.0 }
 0x16a   : > { %v1815_v56 = vmul.f32 0.01, %v1783_v47  ;;  %v1781_v26 = vadd.f32 %v3237_v50, %v1758_v17  ;;  %v1763_v35 = vadd.f32 %v2463_v10, %v1642_v30  ;;  %v1640_v63 = vadd.f32 %v1613_v22, %v1520_v44  ;;  %v2446_v20 = vpop.f32.mrf.mxu1  ;;  %v1737_v12 = vpop.f32.mrf.mxu0 }
 0x16b   : > { %1911 = vst.msk [vmem:[%s3268_s27 + $0x28] sm:$0xf] %vm1900_vm8, %v2216_v38  ;;  %v1828_v51 = vsel %vm1796_vm2, %v1780_v43, %v1812_v8  ;;  %v1643_v21 = vadd.f32 %v2446_v20, %v1523_v6 }
 0x16c   : > { %v2214_v2 = vpack.c.bf16 %v1828_v51, %v1828_v51  ;;  %v1831_v41 = vsel %vm1799_vm3, %v1783_v47, %v1815_v56  ;;  %vm1797_vm4 = vcmp.ge.f32.partialorder %v1781_v26, 0.0  ;;  %v1813_v11 = vmul.f32 0.01, %v1781_v26  ;;  %v1616_v37 = vpop.f32.mrf.mxu1 }
 0x16d   : > { %v2217_v7 = vpack.c.bf16 %v1831_v41, %v1831_v41  ;;  %v1786_v15 = vadd.f32 %v3237_v50, %v1763_v35  ;;  %v1761_v16 = vadd.f32 %v1734_v19, %v1640_v63  ;;  %v1764_v29 = vadd.f32 %v2464_v58, %v1643_v21 }
 0x16e   : > { %1909 = vst.msk [vmem:[%s3268_s27 + $0x20] sm:$0xf] %vm1900_vm8, %v2214_v2  ;;  %v1829_v60 = vsel %vm1797_vm4, %v1781_v26, %v1813_v11  ;;  %v1641_v13 = vadd.f32 %v1616_v37, %v1521_v46 }
 0x16f   : > { %1912 = vst.msk [vmem:[%s3268_s27 + $0x2c] sm:$0xf] %vm1900_vm8, %v2217_v7  ;;  %v2215_v52 = vpack.c.bf16 %v1829_v60, %v1829_v60  ;;  %vm1802_vm5 = vcmp.ge.f32.partialorder %v1786_v15, 0.0  ;;  %v1818_v0 = vmul.f32 0.01, %v1786_v15  ;;  %v1784_v31 = vadd.f32 %v3237_v50, %v1761_v16 }
 0x170   : > { %v1787_v55 = vadd.f32 %v3237_v50, %v1764_v29  ;;  %v1762_v48 = vadd.f32 %v1737_v12, %v1641_v13 }
 0x171   : > { %1910 = vst.msk [vmem:[%s3268_s27 + $0x24] sm:$0xf] %vm1900_vm8, %v2215_v52  ;;  %v1834_v59 = vsel %vm1802_vm5, %v1786_v15, %v1818_v0  ;;  %vm1800_vm6 = vcmp.ge.f32.partialorder %v1784_v31, 0.0  ;;  %v1816_v33 = vmul.f32 0.01, %v1784_v31 }
 0x172   : > { %v2220_v49 = vpack.c.bf16 %v1834_v59, %v1834_v59  ;;  %vm1803_vm7 = vcmp.ge.f32.partialorder %v1787_v55, 0.0  ;;  %v1819_v53 = vmul.f32 0.01, %v1787_v55  ;;  %v1785_v62 = vadd.f32 %v3237_v50, %v1762_v48 }
 0x173   : > { %v1832_v42 = vsel %vm1800_vm6, %v1784_v31, %v1816_v33 }
 0x174   : > { %1915 = vst.msk [vmem:[%s3268_s27 + $0x38] sm:$0xf] %vm1900_vm8, %v2220_v49  ;;  %v2218_v45 = vpack.c.bf16 %v1832_v42, %v1832_v42  ;;  %v1835_v40 = vsel %vm1803_vm7, %v1787_v55, %v1819_v53  ;;  %vm1801_vm9 = vcmp.ge.f32.partialorder %v1785_v62, 0.0  ;;  %v1817_v57 = vmul.f32 0.01, %v1785_v62 }
 0x175   : > { %v2221_v36 = vpack.c.bf16 %v1835_v40, %v1835_v40 }
 0x176   : > { %1913 = vst.msk [vmem:[%s3268_s27 + $0x30] sm:$0xf] %vm1900_vm8, %v2218_v45  ;;  %v1833_v25 = vsel %vm1801_vm9, %v1785_v62, %v1817_v57 }
 0x177   : > { %1916 = vst.msk [vmem:[%s3268_s27 + $0x3c] sm:$0xf] %vm1900_vm8, %v2221_v36  ;;  %v2219_v4 = vpack.c.bf16 %v1833_v25, %v1833_v25 }
 0x179   : > { %1914 = vst.msk [vmem:[%s3268_s27 + $0x34] sm:$0xf] %vm1900_vm8, %v2219_v4 }
 0x17a PF: > { %s15_s22 = sadd.s32 1, %s2585_s22   ;;  %s3399_s18 = smov %s2577_s20 }
 0x17b   : > { %p12_p8 = scmp.ge.s32.totalorder %s15_s22, 6   ;;  %s3400_s19 = smov %s2581_s21 }
 0x17c   : > { %s3401_s20 = smov %s3404_s23  ;;  %s3402_s21 = smov %s3408_s24 }
 0x17d   :  { %14 = sbr.rel (!%p12_p8) target bundleno = 3 (0x3), region = 84 }

// kernel: conv_block_forward.3
= control target key start
LH: loop header
LB: loop body
LE: loop exit
PB: predicated region body
PF: predicated region fallthrough
CT: control target
= control target key end

     0   :  { %s2520_s18 = smov 0   ;;  %s2522_s19 = smov 0   ;;  %s3243_s0 = inlined_call_operand.vmem [shape: bf16[2,2,16,8], index: 0, kind: input, shape index: {}]   ;;  %s3244_s1 = inlined_call_operand.vmem [shape: bf16[2,16,16,8], index: 1, kind: input, shape index: {}]   ;;  %s3245_s2 = inlined_call_operand.vmem [shape: bf16[2,2,16,8], index: 2, kind: input, shape index: {}]   ;;  %s3246_s3 = inlined_call_operand.vmem [shape: bf16[9,8,8], index: 3, kind: input, shape index: {}]   ;;  %s3247_s4 = inlined_call_operand.vmem [shape: f32[1,8], index: 4, kind: input, shape index: {}]   ;;  %s3248_s5 = inlined_call_operand.vmem [shape: f32[2,16,16,8], index: 5, kind: output, shape index: {}]  }
   0x1   :  { %s2524_s20 = smov 0   ;;  %s2526_s21 = smov 0  }
   0x2   :  { %s2528_s22 = smov 0  }
   0x3 LB: > { %s24_s23 = sadd.s32 1, %s2480_s20  ;;  %s27_s24 = sadd.s32 1, %s2484_s21  ;;  %s2488_s22 = sphi %s2528_s22, %s15_s22   ;;  %s2484_s21 = sphi %s2526_s21, %s3296_s21   ;;  %s2480_s20 = sphi %s2524_s20, %s3295_s20   ;;  %s2476_s19 = sphi %s2522_s19, %s3294_s19   ;;  %s2472_s18 = sphi %s2520_s18, %s3293_s18  }
   0x4   : > { %p25_p0 = scmp.ge.s32.totalorder %s24_s23, 2  ;;  %p1997_p1 = scmp.ge.s32.totalorder %s2488_s22, 1 }
   0x5   : > { %p241_p2 = scmp.lt.s32.totalorder %s2488_s22, 5 }
   0x6   : > { %s3298_s23 = smov (%p25_p0, %s24_s23), 0  ;;  %s3300_s24 = smov (!%p25_p0, %s27_s24), %s2484_s21 }
   0x7   : > { %p242_p3 = pnand %p1997_p1, %p241_p2  ;;  %p29_p4 = scmp.ge.s32.totalorder %s3300_s24, 2 }
   0x9   : > { %s3302_s24 = smov (%p29_p4, %s3300_s24), 0  ;;  %245 = sbr.rel (%p242_p3) target bundleno = 375 (0x177), region = 40 }
   0xe   : > { %v2042_v0 = vld [vmem:[%s3246_s3 + $0x4] sm:$0xf]  ;;  %vm674_vm0 = vcmask 1043456   ;;  %p297_p5 = scmp.lt.s32.totalorder %s2476_s19, 1  ;;  %p299_p6 = scmp.lt.s32.totalorder %s2472_s18, 1  ;;  %vm657_vm1 = vcmask 64512  }
   0xf   : > { %2370 = vmatprep.subr.msk.bf16.mxu0 %vm674_vm0, %v2042_v0  ;;  %2371 = vmatprep.subr.msk.bf16.mxu1 %vm674_vm0, %v2042_v0  ;;  %v676_v1 = vsel %vm674_vm0, %v2042_v0, 0  ;;  %s2001_s27 = sshll.u32 %s2472_s18, 3  ;;  %v654_v2 = vld [vmem:[%s3246_s3] sm:$0xf]  ;;  %v2059_v3 = vld [vmem:[%s3246_s3 + $0x8] sm:$0xf] }
  0x10   : > { %2207 = vmatpush3.bf16.msra.mxu0 %v676_v1  ;;  %2369 = vmatpush3.bf16.msra.mxu1 %v676_v1  ;;  %s3304_s19 = smov (!%p297_p5, %s2476_s19), 1  ;;  %s3306_s18 = smov (!%p299_p6, %s2472_s18), 1  ;;  %v800_v9 = vsel %vm674_vm0, %v654_v2, 0  ;;  %v926_v10 = vsel %vm674_vm0, %v2059_v3, 0  ;;  %vm641_vm2 = vcmask 1047552   ;;  %vm538_vm4 = vcmask 1040384  }
  0x11   : > { %2372 = vmatprep.subr.msk.bf16.mxu1 %vm674_vm0, %v654_v2  ;;  %2373 = vmatprep.subr.msk.bf16.mxu0 %vm674_vm0, %v2059_v3  ;;  %s1999_s7 = sshll.u32 %s3304_s19, 2  ;;  %s1998_s8 = sshll.u32 %s3306_s18, 1  ;;  %vm642_vm3 = vsmask.f32 7424  ;;  %v2068_v17 = vld [vmem:[%s3246_s3 + $0xc] sm:$0xf] }
  0x12   : > { %p309_p7 = scmp.lt.s32.totalorder %s2001_s27, 15  ;;  %s2569_s9 = sadd.s32 %s1999_s7, %s1998_s8  ;;  %v2077_v27 = vld [vmem:[%s3246_s3 + $0x10] sm:$0xf]  ;;  %vm2658_vm5 = vmand %vm641_vm2, %vm642_vm3  ;;  %vm539_vm6 = vsmask.f32 256  ;;  %v2664_v41 = vsel %vm674_vm0, %v2068_v17, 0 }
  0x13   : > { %s2000_s10 = sshll.u32 %s2569_s9, 2  ;;  %s2003_s14 = sshll.u32 %s3304_s19, 5  ;;  %v1167_v50 = vsel %vm674_vm0, %v2077_v27, 0  ;;  %vm2692_vm7 = vmand %vm538_vm4, %vm539_vm6  ;;  %v2113_v39 = vld [vmem:[%s3246_s3 + $0x20] sm:$0xf] }
  0x14   : > { %s305_s13 = scalar_lea.vmem %s3243_s0, %s2000_s10  ;;  %s3308_s27 = smov (!%p309_p7, %s2001_s27), 15 }
  0x15   : > { %v338_v4 = vld [vmem:[%s305_s13] sm:$0xf]  ;;  %v339_v5 = vld [vmem:[%s305_s13 + $0x4] sm:$0xf]  ;;  %s2002_s15 = sshll.u32 %s3308_s27, 1  ;;  %s325_s7 = scalar_lea.vmem %s3245_s2, %s2000_s10 }
  0x16   : > { %v2022_v6 = vcombine.low %v338_v4, %v339_v5  ;;  %v2032_v7 = vcombine.low %v339_v5, %v339_v5  ;;  %s2577_s16 = sadd.s32 %s2003_s14, %s2002_s15  ;;  %v2012_v22 = vcombine.low %v338_v4, %v338_v4  ;;  %v2682_v51 = vld [vmem:[%s325_s7] sm:$0xf]  ;;  %v2684_v52 = vld [vmem:[%s325_s7 + $0x4] sm:$0xf] }
  0x17   : > { %s2004_s17 = sshll.u32 %s2577_s16, 2  ;;  %v2705_v2 = vcombine.low %v2682_v51, %v2684_v52  ;;  %s2011_s19 = sshll.u32 %s2577_s16, 3 }
  0x18   : > { %v462_v8 = vshll.u32 %v2022_v6, 16  ;;  %2208 = vmatprep.mubr.msk.bf16.mxu0 %vm657_vm1, %v2022_v6  ;;  %s2586_s25 = scalar_lea.vmem %s3244_s1, %s2004_s17  ;;  %v459_v11 = vshrl.u32 %v2022_v6, 16  ;;  %v592_v12 = vshll.u32 %v2032_v7, 16  ;;  %v389_v47 = vshrl.u32 %v2012_v22, 16  ;;  %s3154_s26 = scalar_lea.vmem %s3248_s5, %s2011_s19 }
  0x19   : > { %v2589_v14 = vld [vmem:[%s2586_s25] sm:$0xf]  ;;  %v341_v15 = vld [vmem:[%s2586_s25 + $0x4] sm:$0xf]  ;;  %v2593_v16 = vld [vmem:[%s2586_s25 + $0x18] sm:$0xf] }
  0x1a   : > { %v551_v13 = vrot.slane %v462_v8, 1  ;;  %v2599_v18 = vcombine.low %v2589_v14, %v341_v15  ;;  %v2602_v19 = vld [vmem:[%s2586_s25 + $0x1c] sm:$0xf]  ;;  %v2605_v20 = vld [vmem:[%s2586_s25 + $0x20] sm:$0xf]  ;;  %v594_v28 = vrot.slane %v592_v12, 4  ;;  %v2033_v33 = vcombine.low %v341_v15, %v341_v15 }
  0x1b   : > { %v2608_v21 = vld [vmem:[%s2586_s25 + $0x24] sm:$0xf]  ;;  %v2612_v23 = vcombine.low %v2593_v16, %v2602_v19  ;;  %v2619_v25 = vld [vmem:[%s2586_s25 + $0x8] sm:$0xf]  ;;  %v343_v26 = vld [vmem:[%s2586_s25 + $0xc] sm:$0xf]  ;;  %v2013_v53 = vcombine.low %v2589_v14, %v2589_v14  ;;  %v2036_v5 = vcombine.low %v2602_v19, %v2602_v19 }
  0x1c   : > { %v2616_v24 = vcombine.low %v2605_v20, %v2608_v21  ;;  %v469_v29 = vshll.u32 %v2599_v18, 16  ;;  %2209 = vmatmul.mubr.msk.bf16.vlgmr.msra.gmra.mxu0 %vm657_vm1, %v2599_v18  ;;  %v2629_v30 = vcombine.low %v2619_v25, %v343_v26  ;;  %v2632_v31 = vld [vmem:[%s2586_s25 + $0x10] sm:$0xf]  ;;  %v461_v32 = vrot.slane %v459_v11, 7  ;;  %v345_v34 = vld [vmem:[%s2586_s25 + $0x14] sm:$0xf] }
  0x1d   : > { %2216 = vmatprep.mubr.msk.bf16.mxu1 %vm657_vm1, %v2612_v23  ;;  %2243 = vmatpush3.bf16.msra.mxu0 %v926_v10  ;;  %v2638_v35 = vld [vmem:[%s2586_s25 + $0x28] sm:$0xf]  ;;  %v2641_v36 = vld [vmem:[%s2586_s25 + $0x2c] sm:$0xf]  ;;  %v552_v37 = vor.u32 %v551_v13, %v459_v11  ;;  %v466_v40 = vshrl.u32 %v2599_v18, 16  ;;  %v2034_v46 = vcombine.low %v343_v26, %v343_v26  ;;  %v2676_v48 = vcombine.low %v2632_v31, %v345_v34 }
  0x1e   : > { %2217 = vmatmul.mubr.msk.bf16.vlgmr.msra.gmra.mxu1 %vm657_vm1, %v2616_v24  ;;  %2212 = vmatprep.mubr.msk.bf16.mxu0 %vm657_vm1, %v2629_v30  ;;  %v2654_v38 = vcombine.low %v2638_v35, %v2641_v36  ;;  %v2667_v42 = vld [vmem:[%s2586_s25 + $0x30] sm:$0xf]  ;;  %v2670_v43 = vld [vmem:[%s2586_s25 + $0x34] sm:$0xf]  ;;  %v473_v44 = vshrl.u32 %v2629_v30, 16  ;;  %v476_v45 = vshll.u32 %v2629_v30, 16  ;;  %v464_v49 = vor.u32 %v462_v8, %v461_v32 }
  0x1f   : > { %2225 = vmatpush3.bf16.msra.mxu1 %v800_v9  ;;  %2375 = vmatprep.subr.msk.bf16.mxu0 %vm674_vm0, %v2077_v27  ;;  %v596_v54 = vshll.u32 %v2033_v33, 16  ;;  %v644_v55 = vsel %vm2658_vm5, %v552_v37, %v594_v28  ;;  %v553_v57 = vrot.slane %v469_v29, 1  ;;  %v2698_v58 = vcombine.low %v2667_v42, %v2670_v43 }
  0x20   : > { %2220 = vmatprep.mubr.msk.bf16.mxu1 %vm657_vm1, %v2654_v38  ;;  %2374 = vmatprep.subr.msk.bf16.mxu1 %vm674_vm0, %v2068_v17  ;;  %v468_v59 = vrot.slane %v466_v40, 7  ;;  %v555_v60 = vrot.slane %v476_v45, 1  ;;  %v600_v61 = vshll.u32 %v2034_v46, 16  ;;  %v2014_v62 = vcombine.low %v2619_v25, %v2619_v25 }
  0x21   : > { %v475_v63 = vrot.slane %v473_v44, 7  ;;  %v483_v0 = vshll.u32 %v2676_v48, 16  ;;  %v2035_v1 = vcombine.low %v345_v34, %v345_v34  ;;  %v541_v3 = vsel %vm2692_vm7, %v389_v47, %v464_v49  ;;  %v2749_v47 = vld [vmem:[%s3246_s3 + $0x18] sm:$0xf] }
  0x22   : > { %v480_v4 = vshrl.u32 %v2676_v48, 16  ;;  %v392_v6 = vshrl.u32 %v2013_v53, 16  ;;  %v598_v7 = vrot.slane %v596_v54, 4  ;;  %v554_v8 = vor.u32 %v553_v57, %v466_v40 }
  0x23   : > { %v487_v9 = vshrl.u32 %v2612_v23, 16  ;;  %v471_v10 = vor.u32 %v469_v29, %v468_v59  ;;  %v556_v11 = vor.u32 %v555_v60, %v473_v44  ;;  %v602_v12 = vrot.slane %v600_v61, 4  ;;  %v2761_v60 = vld [vmem:[%s3246_s3 + $0x14] sm:$0xf] }
  0x24   : > { %2213 = vmatmul.mubr.msk.bf16.gmra.mxu0 %vm657_vm1, %v2676_v48  ;;  %v490_v13 = vshll.u32 %v2612_v23, 16  ;;  %v395_v14 = vshrl.u32 %v2014_v62, 16  ;;  %v478_v15 = vor.u32 %v476_v45, %v475_v63  ;;  %v557_v17 = vrot.slane %v483_v0, 1 }
  0x25   : > { %2244 = vmatprep.mubr.msk.bf16.mxu0 %vm657_vm1, %v644_v55  ;;  %v604_v19 = vshll.u32 %v2035_v1, 16  ;;  %v2015_v22 = vcombine.low %v2632_v31, %v2632_v31  ;;  %v482_v25 = vrot.slane %v480_v4, 7  ;;  %v608_v26 = vshll.u32 %v2036_v5, 16  ;;  %v2776_v1 = vld [vmem:[%s2586_s25 + $0x38] sm:$0xf] }
  0x26   : > { %2221 = vmatmul.mubr.msk.bf16.gmra.mxu1 %vm657_vm1, %v2698_v58  ;;  %v2021_v27 = vcombine.low %v2682_v51, %v2682_v51  ;;  %v2726_v28 = vsel %vm2658_vm5, %v554_v8, %v598_v7  ;;  %v559_v29 = vrot.slane %v490_v13, 1  ;;  %v2016_v32 = vcombine.low %v2593_v16, %v2593_v16 }
  0x27   : > { %2226 = vmatprep.mubr.msk.bf16.mxu1 %vm657_vm1, %v541_v3  ;;  %v489_v33 = vrot.slane %v487_v9, 7  ;;  %v2732_v34 = vsel %vm2692_vm7, %v392_v6, %v471_v10  ;;  %v2736_v31 = vsel %vm2658_vm5, %v556_v11, %v602_v12  ;;  %v494_v37 = vshrl.u32 %v2616_v24, 16  ;;  %v355_v3 = vld [vmem:[%s2586_s25 + $0x3c] sm:$0xf] }
  0x28   : > { %v497_v40 = vshll.u32 %v2616_v24, 16  ;;  %v2742_v44 = vsel %vm2692_vm7, %v395_v14, %v478_v15  ;;  %v558_v45 = vor.u32 %v557_v17, %v480_v4  ;;  %v606_v46 = vrot.slane %v604_v19, 4 }
  0x29   : > { %v2037_v16 = vcombine.low %v2608_v21, %v2608_v21  ;;  %v398_v49 = vshrl.u32 %v2015_v22, 16  ;;  %v485_v51 = vor.u32 %v483_v0, %v482_v25  ;;  %v610_v53 = vrot.slane %v608_v26, 4 }
  0x2a   : > { %v504_v54 = vshll.u32 %v2654_v38, 16  ;;  %v560_v55 = vor.u32 %v559_v29, %v487_v9  ;;  %v401_v21 = vshrl.u32 %v2016_v32, 16  ;;  %v492_v57 = vor.u32 %v490_v13, %v489_v33 }
  0x2b   : > { %v2038_v59 = vcombine.low %v2641_v36, %v2641_v36  ;;  %v2017_v61 = vcombine.low %v2605_v20, %v2605_v20  ;;  %v496_v62 = vrot.slane %v494_v37, 7  ;;  %v2769_v63 = vshrl.u32 %v2021_v27, 16 }
  0x2c   : > { %2245 = vmatmul.mubr.msk.bf16.vlgmr.msra.gmra.mxu0 %vm657_vm1, %v2726_v28  ;;  %v612_v36 = vshll.u32 %v2037_v16, 16  ;;  %v501_v0 = vshrl.u32 %v2654_v38, 16  ;;  %v2781_v20 = vsel %vm2658_vm5, %v558_v45, %v606_v46  ;;  %v563_v4 = vrot.slane %v504_v54, 1 }
  0x2d   : > { %2279 = vmatpush3.bf16.msra.mxu0 %v1167_v50  ;;  %2248 = vmatprep.mubr.msk.bf16.mxu0 %vm657_vm1, %v2736_v31  ;;  %v561_v50 = vrot.slane %v497_v40, 1  ;;  %v522_v5 = vshrl.u32 %v2705_v2, 16  ;;  %v2789_v6 = vsel %vm2692_vm7, %v398_v49, %v485_v51  ;;  %v2793_v7 = vsel %vm2658_vm5, %v560_v55, %v610_v53 }
  0x2e   : > { %2227 = vmatmul.mubr.msk.bf16.vlgmr.msra.gmra.mxu1 %vm657_vm1, %v2732_v34  ;;  %2377 = vmatprep.subr.msk.bf16.mxu0 %vm674_vm0, %v2749_v47  ;;  %v2797_v8 = vsel %vm2692_vm7, %v401_v21, %v492_v57  ;;  %v616_v9 = vshll.u32 %v2038_v59, 16  ;;  %v404_v11 = vshrl.u32 %v2017_v61, 16  ;;  %v499_v12 = vor.u32 %v497_v40, %v496_v62 }
  0x2f   : > { %2261 = vmatpush3.bf16.msra.mxu1 %v2664_v41  ;;  %2230 = vmatprep.mubr.msk.bf16.mxu1 %vm657_vm1, %v2742_v44  ;;  %v525_v41 = vshll.u32 %v2705_v2, 16  ;;  %v562_v10 = vor.u32 %v561_v50, %v494_v37  ;;  %v2800_v13 = vcombine.low %v2776_v1, %v355_v3  ;;  %v614_v14 = vrot.slane %v612_v36, 4 }
  0x30   : > { %2376 = vmatprep.subr.msk.bf16.mxu1 %vm674_vm0, %v2761_v60  ;;  %v2018_v15 = vcombine.low %v2638_v35, %v2638_v35  ;;  %v503_v17 = vrot.slane %v501_v0, 7  ;;  %v511_v19 = vshll.u32 %v2698_v58, 16  ;;  %v564_v22 = vor.u32 %v563_v4, %v501_v0 }
  0x31   : > { %v518_v25 = vshll.u32 %v2800_v13, 16  ;;  %v524_v26 = vrot.slane %v522_v5, 7  ;;  %v2040_v27 = vcombine.low %v355_v3, %v355_v3  ;;  %v618_v29 = vrot.slane %v616_v9, 4 }
  0x32   : > { %v2039_v32 = vcombine.low %v2670_v43, %v2670_v43  ;;  %v569_v33 = vrot.slane %v525_v41, 1  ;;  %v2041_v35 = vcombine.low %v2684_v52, %v2684_v52  ;;  %v515_v37 = vshrl.u32 %v2800_v13, 16 }
  0x33   : > { %v2817_v40 = vor.u32 %v525_v41, %v524_v26  ;;  %v567_v45 = vrot.slane %v518_v25, 1  ;;  %v624_v46 = vshll.u32 %v2040_v27, 16  ;;  %v407_v16 = vshrl.u32 %v2018_v15, 16 }
  0x34   : > { %2249 = vmatmul.mubr.msk.bf16.gmra.mxu0 %vm657_vm1, %v2781_v20  ;;  %v508_v43 = vshrl.u32 %v2698_v58, 16  ;;  %v570_v49 = vor.u32 %v569_v33, %v522_v5  ;;  %v628_v51 = vshll.u32 %v2041_v35, 16  ;;  %v506_v52 = vor.u32 %v504_v54, %v503_v17 }
  0x35   : > { %2252 = vmatprep.mubr.msk.bf16.mxu0 %vm657_vm1, %v2793_v7  ;;  %v550_v53 = vsel %vm2692_vm7, %v2769_v63, %v2817_v40  ;;  %v568_v55 = vor.u32 %v567_v45, %v515_v37  ;;  %v626_v21 = vrot.slane %v624_v46, 4  ;;  %v2830_v57 = vsel %vm2658_vm5, %v562_v10, %v614_v14 }
  0x36   : > { %2231 = vmatmul.mubr.msk.bf16.gmra.mxu1 %vm657_vm1, %v2789_v6  ;;  %v565_v59 = vrot.slane %v511_v19, 1  ;;  %v620_v50 = vshll.u32 %v2039_v32, 16  ;;  %v630_v61 = vrot.slane %v628_v51, 4  ;;  %v2834_v62 = vsel %vm2658_vm5, %v564_v22, %v618_v29 }
  0x37   : > { %2234 = vmatprep.mubr.msk.bf16.mxu1 %vm657_vm1, %v2797_v8  ;;  %v2838_v54 = vsel %vm2658_vm5, %v568_v55, %v626_v21  ;;  %v546_v36 = vsel %vm2692_vm7, %v404_v11, %v499_v12  ;;  %v2019_v0 = vcombine.low %v2667_v42, %v2667_v42  ;;  %v510_v3 = vrot.slane %v508_v43, 7 }
  0x38   : > { %v2846_v4 = vsel %vm2658_vm5, %v570_v49, %v630_v61  ;;  %v547_v5 = vsel %vm2692_vm7, %v407_v16, %v506_v52  ;;  %v566_v41 = vor.u32 %v565_v59, %v508_v43  ;;  %v622_v9 = vrot.slane %v620_v50, 4 }
  0x39   : > { %v410_v42 = vshrl.u32 %v2019_v0, 16  ;;  %v513_v10 = vor.u32 %v511_v19, %v510_v3  ;;  %v1409_v14 = vsel %vm674_vm0, %v2749_v47, 0  ;;  %v1288_v15 = vsel %vm674_vm0, %v2761_v60, 0 }
  0x3a   : > { %v2858_v11 = vsel %vm2658_vm5, %v566_v41, %v622_v9  ;;  %v517_v47 = vrot.slane %v515_v37, 7 }
  0x3b   : > { %v548_v12 = vsel %vm2692_vm7, %v410_v42, %v513_v10 }
  0x3c   : > { %2253 = vmatmul.mubr.msk.bf16.gmra.mxu0 %vm657_vm1, %v2830_v57  ;;  %v520_v17 = vor.u32 %v518_v25, %v517_v47 }
  0x3d   : > { %2256 = vmatprep.mubr.msk.bf16.mxu0 %vm657_vm1, %v2834_v62 }
  0x3e   : > { %2235 = vmatmul.mubr.msk.bf16.gmra.mxu1 %vm657_vm1, %v546_v36 }
  0x3f   : > { %2238 = vmatprep.mubr.msk.bf16.mxu1 %vm657_vm1, %v547_v5 }
  0x44   : > { %2257 = vmatmul.mubr.msk.bf16.gmra.mxu0 %vm657_vm1, %v2858_v11 }
  0x45   : > { %2280 = vmatprep.mubr.msk.bf16.mxu0 %vm657_vm1, %v2599_v18  ;;  %v2104_v18 = vld [vmem:[%s3246_s3 + $0x1c] sm:$0xf] }
  0x46   : > { %2239 = vmatmul.mubr.msk.bf16.gmra.mxu1 %vm657_vm1, %v548_v12  ;;  %v1529_v22 = vsel %vm674_vm0, %v2104_v18, 0 }
  0x47   : > { %2262 = vmatprep.mubr.msk.bf16.mxu1 %vm657_vm1, %v2732_v34  ;;  %v2020_v34 = vcombine.low %v2776_v1, %v2776_v1  ;;  %v1650_v1 = vsel %vm674_vm0, %v2113_v39, 0 }
  0x49   : > { %v413_v60 = vshrl.u32 %v2020_v34, 16 }
  0x4b   : > { %v549_v19 = vsel %vm2692_vm7, %v413_v60, %v520_v17 }
  0x4c   : > { %2281 = vmatmul.mubr.msk.bf16.vlgmr.msra.gmra.mxu0 %vm657_vm1, %v2629_v30 }
  0x4d   : > { %2315 = vmatpush3.bf16.msra.mxu0 %v1409_v14  ;;  %2284 = vmatprep.mubr.msk.bf16.mxu0 %vm657_vm1, %v2676_v48 }
  0x4e   : > { %2263 = vmatmul.mubr.msk.bf16.vlgmr.msra.gmra.mxu1 %vm657_vm1, %v2742_v44  ;;  %2379 = vmatprep.subr.msk.bf16.mxu0 %vm674_vm0, %v2113_v39 }
  0x4f   : > { %2297 = vmatpush3.bf16.msra.mxu1 %v1288_v15  ;;  %2266 = vmatprep.mubr.msk.bf16.mxu1 %vm657_vm1, %v2789_v6 }
  0x50   : > { %2378 = vmatprep.subr.msk.bf16.mxu1 %vm674_vm0, %v2104_v18 }
  0x54   : > { %2285 = vmatmul.mubr.msk.bf16.gmra.mxu0 %vm657_vm1, %v2612_v23 }
  0x55   : > { %2288 = vmatprep.mubr.msk.bf16.mxu0 %vm657_vm1, %v2616_v24 }
  0x56   : > { %2267 = vmatmul.mubr.msk.bf16.gmra.mxu1 %vm657_vm1, %v2797_v8 }
  0x57   : > { %2270 = vmatprep.mubr.msk.bf16.mxu1 %vm657_vm1, %v546_v36 }
  0x5c   : > { %2289 = vmatmul.mubr.msk.bf16.gmra.mxu0 %vm657_vm1, %v2654_v38 }
  0x5d   : > { %2292 = vmatprep.mubr.msk.bf16.mxu0 %vm657_vm1, %v2698_v58 }
  0x5e   : > { %2271 = vmatmul.mubr.msk.bf16.gmra.mxu1 %vm657_vm1, %v547_v5 }
  0x5f   : > { %2274 = vmatprep.mubr.msk.bf16.mxu1 %vm657_vm1, %v548_v12 }
  0x64   : > { %2293 = vmatmul.mubr.msk.bf16.gmra.mxu0 %vm657_vm1, %v2800_v13 }
  0x65   : > { %2316 = vmatprep.mubr.msk.bf16.mxu0 %vm657_vm1, %v2742_v44 }
  0x66   : > { %2275 = vmatmul.mubr.msk.bf16.gmra.mxu1 %vm657_vm1, %v549_v19 }
  0x67   : > { %2298 = vmatprep.mubr.msk.bf16.mxu1 %vm657_vm1, %v2726_v28 }
  0x6c   : > { %2317 = vmatmul.mubr.msk.bf16.vlgmr.msra.gmra.mxu0 %vm657_vm1, %v2789_v6 }
  0x6d   : > { %2351 = vmatpush3.bf16.msra.mxu0 %v1650_v1  ;;  %2320 = vmatprep.mubr.msk.bf16.mxu0 %vm657_vm1, %v2797_v8 }
  0x6e   : > { %2299 = vmatmul.mubr.msk.bf16.vlgmr.msra.gmra.mxu1 %vm657_vm1, %v2736_v31 }
  0x6f   : > { %2333 = vmatpush3.bf16.msra.mxu1 %v1529_v22  ;;  %2302 = vmatprep.mubr.msk.bf16.mxu1 %vm657_vm1, %v2781_v20 }
  0x74   : > { %2321 = vmatmul.mubr.msk.bf16.gmra.mxu0 %vm657_vm1, %v546_v36 }
  0x75   : > { %2324 = vmatprep.mubr.msk.bf16.mxu0 %vm657_vm1, %v547_v5 }
  0x76   : > { %2303 = vmatmul.mubr.msk.bf16.gmra.mxu1 %vm657_vm1, %v2793_v7 }
  0x77   : > { %2306 = vmatprep.mubr.msk.bf16.mxu1 %vm657_vm1, %v2830_v57 }
  0x7c   : > { %2325 = vmatmul.mubr.msk.bf16.gmra.mxu0 %vm657_vm1, %v548_v12 }
  0x7d   : > { %2328 = vmatprep.mubr.msk.bf16.mxu0 %vm657_vm1, %v549_v19 }
  0x7e   : > { %2307 = vmatmul.mubr.msk.bf16.gmra.mxu1 %vm657_vm1, %v2834_v62 }
  0x7f   : > { %2310 = vmatprep.mubr.msk.bf16.mxu1 %vm657_vm1, %v2858_v11 }
  0x84   : > { %2329 = vmatmul.mubr.msk.bf16.gmra.mxu0 %vm657_vm1, %v550_v53 }
  0x85   : > { %2352 = vmatprep.mubr.msk.bf16.mxu0 %vm657_vm1, %v2736_v31 }
  0x86   : > { %2311 = vmatmul.mubr.msk.bf16.gmra.mxu1 %vm657_vm1, %v2838_v54 }
  0x87   : > { %2334 = vmatprep.mubr.msk.bf16.mxu1 %vm657_vm1, %v2629_v30 }
  0x8c   : > { %2353 = vmatmul.mubr.msk.bf16.vlgmr.msra.gmra.mxu0 %vm657_vm1, %v2781_v20 }
  0x8d   : > { %2356 = vmatprep.mubr.msk.bf16.mxu0 %vm657_vm1, %v2793_v7 }
  0x8e   : > { %2335 = vmatmul.mubr.msk.bf16.vlgmr.msra.gmra.mxu1 %vm657_vm1, %v2676_v48 }
  0x8f   : > { %2338 = vmatprep.mubr.msk.bf16.mxu1 %vm657_vm1, %v2612_v23 }
  0x94   : > { %2357 = vmatmul.mubr.msk.bf16.gmra.mxu0 %vm657_vm1, %v2830_v57 }
  0x95   : > { %2360 = vmatprep.mubr.msk.bf16.mxu0 %vm657_vm1, %v2834_v62 }
  0x96   : > { %2339 = vmatmul.mubr.msk.bf16.gmra.mxu1 %vm657_vm1, %v2616_v24 }
  0x97   : > { %2342 = vmatprep.mubr.msk.bf16.mxu1 %vm657_vm1, %v2654_v38 }
  0x9c   : > { %2361 = vmatmul.mubr.msk.bf16.gmra.mxu0 %vm657_vm1, %v2858_v11 }
  0x9d   : > { %2364 = vmatprep.mubr.msk.bf16.mxu0 %vm657_vm1, %v2838_v54 }
  0x9e   : > { %2343 = vmatmul.mubr.msk.bf16.gmra.mxu1 %vm657_vm1, %v2698_v58 }
  0x9f   : > { %2346 = vmatprep.mubr.msk.bf16.mxu1 %vm657_vm1, %v2800_v13 }
  0xa4   : > { %2365 = vmatmul.mubr.msk.bf16.gmra.mxu0 %vm657_vm1, %v2846_v4 }
  0xa6   : > { %2347 = vmatmul.mubr.msk.bf16.gmra.mxu1 %vm657_vm1, %v2705_v2 }
  0xdc   : > { %v2210_v23 = vpop.f32.mrf.mxu0 }
  0xde   : > { %v2218_v24 = vpop.f32.mrf.mxu1  ;;  %v712_v30 = vpop.f32.mrf.mxu0 }
  0xe0   : > { %v744_v38 = vpop.f32.mrf.mxu1  ;;  %v2211_v48 = vpop.f32.mrf.mxu0 }
  0xe2   : > { %v2219_v56 = vpop.f32.mrf.mxu1  ;;  %v715_v28 = vpop.f32.mrf.mxu0 }
  0xe4   : > { %v747_v31 = vpop.f32.mrf.mxu1  ;;  %v2214_v44 = vpop.f32.mrf.mxu0 }
  0xe6   : > { %v2222_v63 = vpop.f32.mrf.mxu1  ;;  %v728_v58 = vpop.f32.mrf.mxu0 }
  0xe8   : > { %v760_v20 = vpop.f32.mrf.mxu1  ;;  %v2215_v6 = vpop.f32.mrf.mxu0 }
  0xea   : > { %v2223_v7 = vpop.f32.mrf.mxu1  ;;  %v731_v8 = vpop.f32.mrf.mxu0 }
  0xec   : > { %v2977_v13 = vpop.f32.mrf.mxu1  ;;  %v2246_v25 = vpop.f32.mrf.mxu0 }
  0xee   : > { %v2228_v26 = vpop.f32.mrf.mxu1  ;;  %v962_v2 = vpop.f32.mrf.mxu0 }
  0xef   : > { %v845_v27 = vadd.f32 %v2228_v26, %v2210_v23 }
  0xf0   : > { %v836_v29 = vpop.f32.mrf.mxu1  ;;  %v2247_v32 = vpop.f32.mrf.mxu0 }
  0xf1   : > { %v837_v33 = vadd.f32 %v836_v29, %v712_v30  ;;  %v2979_v35 = vadd.f32 %v2246_v25, %v845_v27 }
  0xf2   : > { %v2229_v37 = vpop.f32.mrf.mxu1  ;;  %v965_v40 = vpop.f32.mrf.mxu0 }
  0xf3   : > { %v848_v45 = vadd.f32 %v2229_v37, %v2211_v48  ;;  %v2981_v46 = vadd.f32 %v962_v2, %v837_v33 }
  0xf4   : > { %v839_v16 = vpop.f32.mrf.mxu1  ;;  %v2250_v43 = vpop.f32.mrf.mxu0 }
  0xf5   : > { %v840_v49 = vadd.f32 %v839_v16, %v715_v28  ;;  %v2983_v51 = vadd.f32 %v2247_v32, %v848_v45 }
  0xf6   : > { %v2232_v52 = vpop.f32.mrf.mxu1  ;;  %v978_v53 = vpop.f32.mrf.mxu0 }
  0xf7   : > { %v861_v55 = vadd.f32 %v2232_v52, %v2214_v44  ;;  %v2985_v21 = vadd.f32 %v965_v40, %v840_v49 }
  0xf8   : > { %v852_v57 = vpop.f32.mrf.mxu1  ;;  %v2251_v59 = vpop.f32.mrf.mxu0 }
  0xf9   : > { %v853_v50 = vadd.f32 %v852_v57, %v728_v58  ;;  %v2987_v61 = vadd.f32 %v2250_v43, %v861_v55 }
  0xfa   : > { %v2233_v62 = vpop.f32.mrf.mxu1  ;;  %v981_v54 = vpop.f32.mrf.mxu0 }
  0xfb   : > { %v864_v36 = vadd.f32 %v2233_v62, %v2215_v6  ;;  %v2989_v0 = vadd.f32 %v978_v53, %v853_v50 }
  0xfc   : > { %v855_v3 = vpop.f32.mrf.mxu1  ;;  %v2254_v4 = vpop.f32.mrf.mxu0 }
  0xfd   : > { %v856_v5 = vadd.f32 %v855_v3, %v731_v8  ;;  %v2991_v41 = vadd.f32 %v2251_v59, %v864_v36 }
  0xfe   : > { %v2236_v9 = vpop.f32.mrf.mxu1  ;;  %v994_v42 = vpop.f32.mrf.mxu0 }
  0xff   : > { %v877_v10 = vadd.f32 %v2236_v9, %v2218_v24  ;;  %v2993_v11 = vadd.f32 %v981_v54, %v856_v5 }
 0x100   : > { %v868_v12 = vpop.f32.mrf.mxu1  ;;  %v2255_v14 = vpop.f32.mrf.mxu0 }
 0x101   : > { %v869_v39 = vadd.f32 %v868_v12, %v744_v38  ;;  %v2995_v15 = vadd.f32 %v2254_v4, %v877_v10 }
 0x102   : > { %v2237_v18 = vpop.f32.mrf.mxu1  ;;  %v997_v34 = vpop.f32.mrf.mxu0 }
 0x103   : > { %v880_v47 = vadd.f32 %v2237_v18, %v2219_v56  ;;  %v2997_v60 = vadd.f32 %v994_v42, %v869_v39 }
 0x104   : > { %v871_v17 = vpop.f32.mrf.mxu1  ;;  %v2258_v19 = vpop.f32.mrf.mxu0 }
 0x105   : > { %v872_v1 = vadd.f32 %v871_v17, %v747_v31  ;;  %v2999_v22 = vadd.f32 %v2255_v14, %v880_v47 }
 0x106   : > { %v2240_v23 = vpop.f32.mrf.mxu1  ;;  %v1010_v30 = vpop.f32.mrf.mxu0 }
 0x107   : > { %v893_v24 = vadd.f32 %v2240_v23, %v2222_v63  ;;  %v3001_v48 = vadd.f32 %v997_v34, %v872_v1 }
 0x108   : > { %v884_v28 = vpop.f32.mrf.mxu1  ;;  %v2259_v44 = vpop.f32.mrf.mxu0 }
 0x109   : > { %v885_v38 = vadd.f32 %v884_v28, %v760_v20  ;;  %v3003_v58 = vadd.f32 %v2258_v19, %v893_v24 }
 0x10a   : > { %v2241_v6 = vpop.f32.mrf.mxu1  ;;  %v1013_v8 = vpop.f32.mrf.mxu0 }
 0x10b   : > { %v896_v56 = vadd.f32 %v2241_v6, %v2223_v7  ;;  %v3005_v25 = vadd.f32 %v1010_v30, %v885_v38 }
 0x10c   : > { %v887_v26 = vpop.f32.mrf.mxu1  ;;  %v3007_v2 = vpop.f32.mrf.mxu0 }
 0x10d   : > { %v888_v31 = vadd.f32 %v887_v26, %v2977_v13  ;;  %v3010_v27 = vadd.f32 %v2259_v44, %v896_v56 }
 0x10e   : > { %v2264_v63 = vpop.f32.mrf.mxu1  ;;  %v3012_v29 = vpop.f32.mrf.mxu0 }
 0x10f   : > { %v3014_v32 = vadd.f32 %v1013_v8, %v888_v31 }
 0x110   : > { %v1083_v20 = vpop.f32.mrf.mxu1  ;;  %v3016_v33 = vpop.f32.mrf.mxu0 }
 0x111   : > { %3253 = vst [vmem:[#allocation2_spill] sm:$0xff] %v3014_v32 }
 0x112   : > { %v2265_v37 = vpop.f32.mrf.mxu1  ;;  %v3018_v40 = vpop.f32.mrf.mxu0 }
 0x114   : > { %v1086_v7 = vpop.f32.mrf.mxu1  ;;  %v3020_v45 = vpop.f32.mrf.mxu0 }
 0x116   : > { %v2268_v16 = vpop.f32.mrf.mxu1  ;;  %v3022_v43 = vpop.f32.mrf.mxu0 }
 0x118   : > { %v1099_v13 = vpop.f32.mrf.mxu1  ;;  %v3024_v49 = vpop.f32.mrf.mxu0 }
 0x11a   : > { %v2269_v52 = vpop.f32.mrf.mxu1  ;;  %v3026_v53 = vpop.f32.mrf.mxu0 }
 0x11c   : > { %v1102_v55 = vpop.f32.mrf.mxu1  ;;  %v3028_v57 = vpop.f32.mrf.mxu0 }
 0x11e   : > { %v2272_v59 = vpop.f32.mrf.mxu1  ;;  %v3030_v50 = vpop.f32.mrf.mxu0 }
 0x120   : > { %v1115_v62 = vpop.f32.mrf.mxu1  ;;  %v3032_v54 = vpop.f32.mrf.mxu0 }
 0x122   : > { %v2273_v36 = vpop.f32.mrf.mxu1  ;;  %v3034_v3 = vpop.f32.mrf.mxu0 }
 0x124   : > { %v1118_v4 = vpop.f32.mrf.mxu1  ;;  %v3036_v5 = vpop.f32.mrf.mxu0 }
 0x126   : > { %v2276_v9 = vpop.f32.mrf.mxu1  ;;  %v3038_v42 = vpop.f32.mrf.mxu0 }
 0x128   : > { %v3040_v10 = vpop.f32.mrf.mxu1  ;;  %v3042_v12 = vpop.f32.mrf.mxu0 }
 0x129   : > { %3254 = vst [vmem:[#allocation3_spill] sm:$0xff] %v3042_v12 }
 0x12a   : > { %v3044_v14 = vpop.f32.mrf.mxu1  ;;  %v3046_v39 = vpop.f32.mrf.mxu0 }
 0x12b   : > { %3255 = vst [vmem:[#allocation4_spill] sm:$0xff] %v3046_v39 }
 0x12c   : > { %v3048_v18 = vpop.f32.mrf.mxu1  ;;  %v2318_v34 = vpop.f32.mrf.mxu0 }
 0x12d   : > { %3256 = vst [vmem:[#allocation5_spill] sm:$0xff] %v3048_v18 }
 0x12e   : > { %v2300_v47 = vpop.f32.mrf.mxu1  ;;  %v1445_v17 = vpop.f32.mrf.mxu0 }
 0x130   : > { %v1324_v19 = vpop.f32.mrf.mxu1  ;;  %v3050_v1 = vpop.f32.mrf.mxu0 }
 0x132   : > { %v2301_v23 = vpop.f32.mrf.mxu1  ;;  %v3052_v30 = vpop.f32.mrf.mxu0 }
 0x133   : > { %3257 = vst [vmem:[#allocation6_spill] sm:$0xff] %v3052_v30 }
 0x134   : > { %v1327_v24 = vpop.f32.mrf.mxu1  ;;  %v3054_v28 = vpop.f32.mrf.mxu0 }
 0x135   : > { %3258 = vst [vmem:[#allocation7_spill] sm:$0xff] %v3054_v28 }
 0x136   : > { %v2304_v44 = vpop.f32.mrf.mxu1  ;;  %v3056_v38 = vpop.f32.mrf.mxu0 }
 0x137   : > { %3259 = vst [vmem:[#allocation8_spill] sm:$0xff] %v3056_v38 }
 0x138   : > { %v3058_v6 = vpop.f32.mrf.mxu1  ;;  %v3060_v8 = vpop.f32.mrf.mxu0 }
 0x139   : > { %3260 = vst [vmem:[#allocation9_spill] sm:$0xff] %v3060_v8  ;;  %v1148_v8 = vadd.f32 %v2264_v63, %v2979_v35  ;;  %v1152_v35 = vadd.f32 %v2268_v16, %v2987_v61  ;;  %v1154_v61 = vadd.f32 %v1115_v62, %v2997_v60 }
 0x13a   : > { %v3062_v56 = vpop.f32.mrf.mxu1  ;;  %v3064_v26 = vpop.f32.mrf.mxu0 }
 0x13b   : > { %3261 = vst [vmem:[#allocation10_spill] sm:$0xff] %v3062_v56  ;;  %3262 = vst [vmem:[#allocation11_spill] sm:$0xff] %v3064_v26 }
 0x13c   : > { %v3066_v31 = vpop.f32.mrf.mxu1  ;;  %v3068_v39 = vpop.f32.mrf.mxu0 }
 0x13d   : > { %3263 = vst [vmem:[#allocation12_spill] sm:$0xff] %v3066_v31  ;;  %3264 = vst [vmem:[#allocation13_spill] sm:$0xff] %v3068_v39  ;;  %v1146_v39 = vadd.f32 %v1083_v20, %v2981_v46  ;;  %v1150_v46 = vadd.f32 %v1099_v13, %v2989_v0  ;;  %v1153_v20 = vadd.f32 %v2269_v52, %v2991_v41 }
 0x13e   : > { %v3070_v12 = vpop.f32.mrf.mxu1  ;;  %v3072_v30 = vpop.f32.mrf.mxu0  ;;  %v1157_v41 = vadd.f32 %v2273_v36, %v2999_v22  ;;  %v1272_v52 = vadd.f32 %v3020_v45, %v1152_v35 }
 0x13f   : > { %3265 = vst [vmem:[#allocation14_spill] sm:$0xff] %v3070_v12  ;;  %3266 = vst [vmem:[#allocation15_spill] sm:$0xff] %v3072_v30  ;;  %v1149_v30 = vadd.f32 %v2265_v37, %v2983_v51 }
 0x140   : > { %v3074_v28 = vpop.f32.mrf.mxu1  ;;  %v3076_v18 = vpop.f32.mrf.mxu0 }
 0x141   : > { %3267 = vst [vmem:[#allocation16_spill] sm:$0xff] %v3074_v28  ;;  %3268 = vst [vmem:[#allocation17_spill] sm:$0xff] %v3076_v18  ;;  %v1268_v18 = vadd.f32 %v3007_v2, %v1148_v8  ;;  %v1151_v2 = vadd.f32 %v1102_v55, %v2993_v11  ;;  %v1269_v37 = vadd.f32 %v3016_v33, %v1149_v30 }
 0x142   : > { %v3078_v38 = vpop.f32.mrf.mxu1  ;;  %v3080_v32 = vpop.f32.mrf.mxu0  ;;  %v1155_v11 = vadd.f32 %v1118_v4, %v3001_v48  ;;  %v1160_v55 = vadd.f32 %v2276_v9, %v3003_v58  ;;  %v1270_v33 = vadd.f32 %v3022_v43, %v1150_v46  ;;  %v1274_v58 = vadd.f32 %v3030_v50, %v1154_v61  ;;  %v3128_v43 = vld [vmem:[%s3247_s4] ss:$0 sm:$0xff] }
 0x143   : > { %3269 = vst [vmem:[#allocation18_spill] sm:$0xff] %v3078_v38  ;;  %3270 = vst [vmem:[#allocation19_spill] sm:$0xff] %v3080_v32  ;;  %v1147_v38 = vadd.f32 %v1086_v7, %v2985_v21  ;;  %v1389_v63 = vadd.f32 %v2300_v47, %v1268_v18  ;;  %v1156_v7 = vadd.f32 %v2272_v59, %v2995_v15 }
 0x144   : > { %v3083_v56 = vpop.f32.mrf.mxu1  ;;  %v3085_v26 = vpop.f32.mrf.mxu0  ;;  %v1390_v13 = vadd.f32 %v2301_v23, %v1269_v37  ;;  %v1273_v15 = vadd.f32 %v3024_v49, %v1153_v20  ;;  %v1271_v22 = vadd.f32 %v3026_v53, %v1151_v2  ;;  %v1393_v18 = vadd.f32 %v2304_v44, %v1272_v52  ;;  %v3274_v44 = vld [vmem:[#allocation5_spill] sm:$0xff]  ;;  %v3278_v20 = vld [vmem:[#allocation12_spill] sm:$0xff] }
 0x145   : > { %3271 = vst [vmem:[#allocation20_spill] sm:$0xff] %v3085_v26  ;;  %v1266_v26 = vadd.f32 %v3012_v29, %v1146_v39  ;;  %v1267_v16 = vadd.f32 %v3018_v40, %v1147_v38  ;;  %v1510_v39 = vadd.f32 %v2318_v34, %v1389_v63  ;;  %v1158_v40 = vadd.f32 %v3040_v10, %v3005_v25 }
 0x146   : > { %v3088_v31 = vpop.f32.mrf.mxu1  ;;  %v3090_v12 = vpop.f32.mrf.mxu0  ;;  %v1276_v48 = vadd.f32 %v3028_v57, %v1156_v7  ;;  %v1277_v9 = vadd.f32 %v3032_v54, %v1157_v41  ;;  %v1511_v53 = vadd.f32 %v3050_v1, %v1390_v13  ;;  %v1161_v34 = vadd.f32 %v3044_v14, %v3010_v27  ;;  %v3275_v27 = vld [vmem:[#allocation10_spill] sm:$0xff] }
 0x147   : > { %3272 = vst [vmem:[#allocation21_spill] sm:$0xff] %v3090_v12  ;;  %v1387_v21 = vadd.f32 %v1324_v19, %v1266_v26  ;;  %v1388_v45 = vadd.f32 %v1327_v24, %v1267_v16  ;;  %v1391_v57 = vadd.f32 %v3058_v6, %v1270_v33  ;;  %v1275_v50 = vadd.f32 %v3034_v3, %v1155_v11  ;;  %v3273_v24 = vld [vmem:[#allocation2_spill] sm:$0xff]  ;;  %v3277_v26 = vld [vmem:[#allocation7_spill] sm:$0xff] }
 0x148   : > { %v3095_v28 = vpop.f32.mrf.mxu1  ;;  %v3097_v32 = vpop.f32.mrf.mxu0  ;;  %v3138_v47 = vadd.f32 %v3036_v5, %v1160_v55  ;;  %v3141_v23 = vadd.f32 %v3038_v42, %v1158_v40  ;;  %v3146_v38 = vadd.f32 %v3274_v44, %v3273_v24  ;;  %v1394_v14 = vadd.f32 %v3275_v27, %v1273_v15  ;;  %v3276_v6 = vld [vmem:[#allocation6_spill] sm:$0xff]  ;;  %v3281_v11 = vld [vmem:[#allocation16_spill] sm:$0xff]  ;;  %v3282_v40 = vld [vmem:[#allocation9_spill] sm:$0xff] }
 0x149   : > { %v1508_v36 = vadd.f32 %v1445_v17, %v1387_v21  ;;  %v1509_v3 = vadd.f32 %v3276_v6, %v1388_v45  ;;  %v1514_v35 = vadd.f32 %v3277_v26, %v1393_v18  ;;  %v1392_v2 = vadd.f32 %v3278_v20, %v1271_v22  ;;  %v3279_v21 = vld [vmem:[#allocation14_spill] sm:$0xff]  ;;  %v3283_v18 = vld [vmem:[#allocation3_spill] sm:$0xff] }
 0x14a   : > { %v3103_v12 = vpop.f32.mrf.mxu1  ;;  %v3105_v51 = vpop.f32.mrf.mxu0  ;;  %v1397_v37 = vadd.f32 %v3279_v21, %v1276_v48  ;;  %v1395_v55 = vadd.f32 %v3281_v11, %v1274_v58  ;;  %v1515_v22 = vadd.f32 %v3282_v40, %v1394_v14  ;;  %v1281_v48 = vadd.f32 %v3283_v18, %v1161_v34 }
 0x14c   : > { %v3112_v29 = vpop.f32.mrf.mxu1  ;;  %v2354_v0 = vpop.f32.mrf.mxu0 }
 0x14e   : > { %v2336_v60 = vpop.f32.mrf.mxu1  ;;  %v1686_v59 = vpop.f32.mrf.mxu0 }
 0x14f   : > { %v1630_v62 = vadd.f32 %v2336_v60, %v1510_v39 }
 0x150   : > { %v1565_v49 = vpop.f32.mrf.mxu1  ;;  %v2355_v4 = vpop.f32.mrf.mxu0 }
 0x151   : > { %v1751_v25 = vadd.f32 %v2354_v0, %v1630_v62  ;;  %v1628_v10 = vadd.f32 %v1565_v49, %v1508_v36  ;;  %v3280_v0 = vld [vmem:[#allocation8_spill] sm:$0xff] }
 0x152   : > { %v2337_v17 = vpop.f32.mrf.mxu1  ;;  %v1689_v19 = vpop.f32.mrf.mxu0  ;;  %v1512_v41 = vadd.f32 %v3280_v0, %v1391_v57 }
 0x153   : > { %v1774_v54 = vadd.f32 %v3128_v43, %v1751_v25  ;;  %v1749_v30 = vadd.f32 %v1686_v59, %v1628_v10  ;;  %v1631_v1 = vadd.f32 %v2337_v17, %v1511_v53  ;;  %v3284_v10 = vld [vmem:[#allocation11_spill] sm:$0xff] }
 0x154   : > { %v1568_v8 = vpop.f32.mrf.mxu1  ;;  %v2358_v5 = vpop.f32.mrf.mxu0  ;;  %v1513_v53 = vadd.f32 %v3284_v10, %v1392_v2 }
 0x155   : > { %vm1790_vm8 = vcmp.ge.f32.partialorder %v1774_v54, 0.0  ;;  %v1806_v42 = vmul.f32 0.01, %v1774_v54  ;;  %v1772_v63 = vadd.f32 %v3128_v43, %v1749_v30  ;;  %v1752_v46 = vadd.f32 %v2355_v4, %v1631_v1  ;;  %v3286_v1 = vld [vmem:[#allocation18_spill] sm:$0xff] }
 0x156   : > { %v1629_v7 = vadd.f32 %v1568_v8, %v1509_v3  ;;  %v2340_v61 = vpop.f32.mrf.mxu1  ;;  %v1702_v16 = vpop.f32.mrf.mxu0  ;;  %v1398_v24 = vadd.f32 %v3286_v1, %v1277_v9 }
 0x157   : > { %v1822_v13 = vsel %vm1790_vm8, %v1774_v54, %v1806_v42  ;;  %vm1788_vm9 = vcmp.ge.f32.partialorder %v1772_v63, 0.0  ;;  %v1804_v52 = vmul.f32 0.01, %v1772_v63  ;;  %v1775_v39 = vadd.f32 %v3128_v43, %v1752_v46  ;;  %v3285_v54 = vld [vmem:[#allocation13_spill] sm:$0xff] }
 0x158   : > { %1838 = vst.msk [vmem:[%s3154_s26 + $0x10] sm:$0xff] %vm657_vm1, %v1822_v13  ;;  %v1750_v33 = vadd.f32 %v1689_v19, %v1629_v7  ;;  %v1634_v15 = vadd.f32 %v2340_v61, %v1514_v35  ;;  %v1581_v60 = vpop.f32.mrf.mxu1  ;;  %v2359_v59 = vpop.f32.mrf.mxu0  ;;  %v1518_v30 = vadd.f32 %v3285_v54, %v1397_v37  ;;  %v1396_v35 = vadd.f32 %v3083_v56, %v1275_v50 }
 0x159   : > { %v1820_v62 = vsel %vm1788_vm9, %v1772_v63, %v1804_v52  ;;  %vm1791_vm10 = vcmp.ge.f32.partialorder %v1775_v39, 0.0  ;;  %v1807_v36 = vmul.f32 0.01, %v1775_v39  ;;  %v1632_v45 = vadd.f32 %v1581_v60, %v1512_v41 }
 0x15a   : > { %1836 = vst.msk [vmem:[%s3154_s26] sm:$0xff] %vm657_vm1, %v1820_v62  ;;  %v1773_v49 = vadd.f32 %v3128_v43, %v1750_v33  ;;  %v1755_v58 = vadd.f32 %v2358_v5, %v1634_v15  ;;  %v2341_v4 = vpop.f32.mrf.mxu1  ;;  %v1705_v25 = vpop.f32.mrf.mxu0  ;;  %v3287_v5 = vld [vmem:[#allocation15_spill] sm:$0xff]  ;;  %v1401_v37 = vadd.f32 %v3088_v31, %v3138_v47  ;;  %v1399_v62 = vadd.f32 %v3095_v28, %v3141_v23 }
 0x15b   : > { %v1823_v57 = vsel %vm1791_vm10, %v1775_v39, %v1807_v36  ;;  %v1753_v17 = vadd.f32 %v1702_v16, %v1632_v45  ;;  %v1635_v19 = vadd.f32 %v2341_v4, %v1515_v22  ;;  %v1516_v26 = vadd.f32 %v3287_v5, %v1395_v55  ;;  %v3288_v16 = vld [vmem:[#allocation17_spill] sm:$0xff]  ;;  %v3289_v39 = vld [vmem:[#allocation4_spill] sm:$0xff]  ;;  %v3290_v15 = vld [vmem:[#allocation19_spill] sm:$0xff] }
 0x15c   : > { %1839 = vst.msk [vmem:[%s3154_s26 + $0x18] sm:$0xff] %vm657_vm1, %v1823_v57  ;;  %vm1789_vm11 = vcmp.ge.f32.partialorder %v1773_v49, 0.0  ;;  %v1805_v34 = vmul.f32 0.01, %v1773_v49  ;;  %v1778_v44 = vadd.f32 %v3128_v43, %v1755_v58  ;;  %v1584_v27 = vpop.f32.mrf.mxu1  ;;  %v2362_v14 = vpop.f32.mrf.mxu0  ;;  %v1519_v0 = vadd.f32 %v3288_v16, %v1398_v24 }
 0x15d   : > { %v1776_v6 = vadd.f32 %v3128_v43, %v1753_v17  ;;  %v1756_v3 = vadd.f32 %v2359_v59, %v1635_v19  ;;  %v1633_v8 = vadd.f32 %v1584_v27, %v1513_v53  ;;  %v1279_v11 = vadd.f32 %v3289_v39, %v3146_v38 }
 0x15e   : > { %v1821_v42 = vsel %vm1789_vm11, %v1773_v49, %v1805_v34  ;;  %vm1794_vm12 = vcmp.ge.f32.partialorder %v1778_v44, 0.0  ;;  %v1810_v9 = vmul.f32 0.01, %v1778_v44  ;;  %v2344_v63 = vpop.f32.mrf.mxu1  ;;  %v1718_v46 = vpop.f32.mrf.mxu0  ;;  %v1517_v60 = vadd.f32 %v3290_v15, %v1396_v35  ;;  %v3291_v49 = vld [vmem:[#allocation20_spill] sm:$0xff] }
 0x15f   : > { %1837 = vst.msk [vmem:[%s3154_s26 + $0x8] sm:$0xff] %vm657_vm1, %v1821_v42  ;;  %vm1792_vm13 = vcmp.ge.f32.partialorder %v1776_v6, 0.0  ;;  %v1808_v20 = vmul.f32 0.01, %v1776_v6  ;;  %v1779_v2 = vadd.f32 %v3128_v43, %v1756_v3  ;;  %v1754_v21 = vadd.f32 %v1705_v25, %v1633_v8 }
 0x160   : > { %v1826_v7 = vsel %vm1794_vm12, %v1778_v44, %v1810_v9  ;;  %v1638_v61 = vadd.f32 %v2344_v63, %v1518_v30  ;;  %v1597_v56 = vpop.f32.mrf.mxu1  ;;  %v2363_v50 = vpop.f32.mrf.mxu0  ;;  %v1522_v58 = vadd.f32 %v3291_v49, %v1401_v37  ;;  %v1402_v4 = vadd.f32 %v3103_v12, %v1281_v48  ;;  %v3292_v48 = vld [vmem:[#allocation21_spill] sm:$0xff] }
 0x161   : > { %1842 = vst.msk [vmem:[%s3154_s26 + $0x30] sm:$0xff] %vm657_vm1, %v1826_v7  ;;  %v1824_v41 = vsel %vm1792_vm13, %v1776_v6, %v1808_v20  ;;  %vm1795_vm14 = vcmp.ge.f32.partialorder %v1779_v2, 0.0  ;;  %v1811_v13 = vmul.f32 0.01, %v1779_v2  ;;  %v1777_v52 = vadd.f32 %v3128_v43, %v1754_v21 }
 0x162   : > { %1840 = vst.msk [vmem:[%s3154_s26 + $0x20] sm:$0xff] %vm657_vm1, %v1824_v41  ;;  %v1759_v31 = vadd.f32 %v2362_v14, %v1638_v61  ;;  %v1636_v47 = vadd.f32 %v1597_v56, %v1516_v26  ;;  %v2345_v55 = vpop.f32.mrf.mxu1  ;;  %v1721_v33 = vpop.f32.mrf.mxu0  ;;  %v1400_v57 = vadd.f32 %v3112_v29, %v1279_v11  ;;  %v1520_v34 = vadd.f32 %v3292_v48, %v1399_v62 }
 0x163   : > { %v1827_v59 = vsel %vm1795_vm14, %v1779_v2, %v1811_v13  ;;  %vm1793_vm15 = vcmp.ge.f32.partialorder %v1777_v52, 0.0  ;;  %v1809_v40 = vmul.f32 0.01, %v1777_v52  ;;  %v1639_v22 = vadd.f32 %v2345_v55, %v1519_v0 }
 0x164   : > { %1843 = vst.msk [vmem:[%s3154_s26 + $0x38] sm:$0xff] %vm657_vm1, %v1827_v59  ;;  %v1782_v38 = vadd.f32 %v3128_v43, %v1759_v31  ;;  %v1757_v36 = vadd.f32 %v1718_v46, %v1636_v47  ;;  %v1600_v45 = vpop.f32.mrf.mxu1  ;;  %v2366_v18 = vpop.f32.mrf.mxu0  ;;  %v1523_v5 = vadd.f32 %v3097_v32, %v1402_v4  ;;  %v1521_v35 = vadd.f32 %v3105_v51, %v1400_v57 }
 0x165   : > { %v1825_v25 = vsel %vm1793_vm15, %v1777_v52, %v1809_v40  ;;  %v1760_v10 = vadd.f32 %v2363_v50, %v1639_v22  ;;  %v1637_v53 = vadd.f32 %v1600_v45, %v1517_v60 }
 0x166   : > { %1841 = vst.msk [vmem:[%s3154_s26 + $0x28] sm:$0xff] %vm657_vm1, %v1825_v25  ;;  %vm1798_vm0 = vcmp.ge.f32.partialorder %v1782_v38, 0.0  ;;  %v1814_v28 = vmul.f32 0.01, %v1782_v38  ;;  %v1780_v23 = vadd.f32 %v3128_v43, %v1757_v36  ;;  %v2348_v17 = vpop.f32.mrf.mxu1  ;;  %v1734_v19 = vpop.f32.mrf.mxu0 }
 0x167   : > { %v1783_v54 = vadd.f32 %v3128_v43, %v1760_v10  ;;  %v1758_v30 = vadd.f32 %v1721_v33, %v1637_v53  ;;  %v1642_v1 = vadd.f32 %v2348_v17, %v1522_v58 }
 0x168   : > { %v1830_v24 = vsel %vm1798_vm0, %v1782_v38, %v1814_v28  ;;  %vm1796_vm2 = vcmp.ge.f32.partialorder %v1780_v23, 0.0  ;;  %v1812_v12 = vmul.f32 0.01, %v1780_v23  ;;  %v1613_v44 = vpop.f32.mrf.mxu1  ;;  %v2367_v8 = vpop.f32.mrf.mxu0 }
 0x169   : > { %1846 = vst.msk [vmem:[%s3154_s26 + $0x50] sm:$0xff] %vm657_vm1, %v1830_v24  ;;  %vm1799_vm3 = vcmp.ge.f32.partialorder %v1783_v54, 0.0  ;;  %v1815_v29 = vmul.f32 0.01, %v1783_v54  ;;  %v1781_v27 = vadd.f32 %v3128_v43, %v1758_v30  ;;  %v1763_v14 = vadd.f32 %v2366_v18, %v1642_v1 }
 0x16a   : > { %v1828_v6 = vsel %vm1796_vm2, %v1780_v23, %v1812_v12  ;;  %v1640_v3 = vadd.f32 %v1613_v44, %v1520_v34  ;;  %v2349_v26 = vpop.f32.mrf.mxu1  ;;  %v1737_v61 = vpop.f32.mrf.mxu0 }
 0x16b   : > { %1844 = vst.msk [vmem:[%s3154_s26 + $0x40] sm:$0xff] %vm657_vm1, %v1828_v6  ;;  %v1831_v42 = vsel %vm1799_vm3, %v1783_v54, %v1815_v29  ;;  %vm1797_vm4 = vcmp.ge.f32.partialorder %v1781_v27, 0.0  ;;  %v1813_v9 = vmul.f32 0.01, %v1781_v27  ;;  %v1786_v63 = vadd.f32 %v3128_v43, %v1763_v14 }
 0x16c   : > { %1847 = vst.msk [vmem:[%s3154_s26 + $0x58] sm:$0xff] %vm657_vm1, %v1831_v42  ;;  %v1761_v46 = vadd.f32 %v1734_v19, %v1640_v3  ;;  %v1643_v20 = vadd.f32 %v2349_v26, %v1523_v5  ;;  %v1616_v2 = vpop.f32.mrf.mxu1 }
 0x16d   : > { %v1829_v21 = vsel %vm1797_vm4, %v1781_v27, %v1813_v9  ;;  %vm1802_vm5 = vcmp.ge.f32.partialorder %v1786_v63, 0.0  ;;  %v1818_v32 = vmul.f32 0.01, %v1786_v63  ;;  %v1641_v37 = vadd.f32 %v1616_v2, %v1521_v35 }
 0x16e   : > { %1845 = vst.msk [vmem:[%s3154_s26 + $0x48] sm:$0xff] %vm657_vm1, %v1829_v21  ;;  %v1784_v51 = vadd.f32 %v3128_v43, %v1761_v46  ;;  %v1764_v7 = vadd.f32 %v2367_v8, %v1643_v20 }
 0x16f   : > { %v1834_v56 = vsel %vm1802_vm5, %v1786_v63, %v1818_v32  ;;  %v1762_v50 = vadd.f32 %v1737_v61, %v1641_v37 }
 0x170   : > { %1850 = vst.msk [vmem:[%s3154_s26 + $0x70] sm:$0xff] %vm657_vm1, %v1834_v56  ;;  %vm1800_vm6 = vcmp.ge.f32.partialorder %v1784_v51, 0.0  ;;  %v1816_v16 = vmul.f32 0.01, %v1784_v51  ;;  %v1787_v0 = vadd.f32 %v3128_v43, %v1764_v7 }
 0x171   : > { %v1785_v41 = vadd.f32 %v3128_v43, %v1762_v50 }
 0x172   : > { %v1832_v13 = vsel %vm1800_vm6, %v1784_v51, %v1816_v16  ;;  %vm1803_vm7 = vcmp.ge.f32.partialorder %v1787_v0, 0.0  ;;  %v1819_v52 = vmul.f32 0.01, %v1787_v0 }
 0x173   : > { %1848 = vst.msk [vmem:[%s3154_s26 + $0x60] sm:$0xff] %vm657_vm1, %v1832_v13  ;;  %vm1801_vm8 = vcmp.ge.f32.partialorder %v1785_v41, 0.0  ;;  %v1817_v39 = vmul.f32 0.01, %v1785_v41 }
 0x174   : > { %v1835_v11 = vsel %vm1803_vm7, %v1787_v0, %v1819_v52 }
 0x175   : > { %1851 = vst.msk [vmem:[%s3154_s26 + $0x78] sm:$0xff] %vm657_vm1, %v1835_v11  ;;  %v1833_v31 = vsel %vm1801_vm8, %v1785_v41, %v1817_v39 }
 0x176   : > { %1849 = vst.msk [vmem:[%s3154_s26 + $0x68] sm:$0xff] %vm657_vm1, %v1833_v31 }
 0x177 PF: > { %s15_s22 = sadd.s32 1, %s2488_s22   ;;  %s3293_s18 = smov %s2480_s20 }
 0x178   : > { %p12_p8 = scmp.ge.s32.totalorder %s15_s22, 6   ;;  %s3294_s19 = smov %s2484_s21 }
 0x179   : > { %s3295_s20 = smov %s3298_s23  ;;  %s3296_s21 = smov %s3302_s24 }
 0x17a   :  { %14 = sbr.rel (!%p12_p8) target bundleno = 3 (0x3), region = 84 }

</bundles_post_ra>
